<compile_context>
chip_gen: v5e
topology: v5e:2x2
jax: 0.10.0
libtpu: 0.0.40
codegen_flags: <defaults>
</compile_context>

<pallas_src>
import numpy as np
import jax
import jax.numpy as jnp
from jax.experimental import pallas as pl
from jax.experimental.pallas import tpu as pltpu  # noqa: F401  (TPU backend assumed)

C_PAD = 128  # lane padding for every channel / contraction dimension


def _round_up(n, m):
    return ((n + m - 1) // m) * m


# ----------------------------------------------------------------------------
# Fused Pallas kernel: cnn1 (3 conv/ReLU/pool/BN stages) + fc1 head.
# ----------------------------------------------------------------------------
def siamese_fused_kernel(p1_ref, w1_ref, bns1_ref,
                         s2_ref, w2_ref, bns2_ref,
                         s3_ref, w3_ref, bns3_ref,
                         wf1_ref, bf1_ref, wf2_ref, bf2_ref, wf3_ref, bf3_ref,
                         o_ref):
    f32 = jnp.float32

    def pool_max(y, m):
        # y: (4*m, C), rows grouped pool-position-major; MaxPool2d(2) == max over blocks.
        return jnp.maximum(jnp.maximum(y[0 * m:1 * m], y[1 * m:2 * m]),
                           jnp.maximum(y[2 * m:3 * m], y[3 * m:4 * m]))

    def bias_relu_pool_bn(acc, bns_ref, m):
        y = jnp.maximum(acc + bns_ref[0:1, :], 0.0)       # shared bias + ReLU, once
        x = pool_max(y, m)                                 # MaxPool2d(2)
        return x * bns_ref[1:2, :] + bns_ref[2:3, :]       # BatchNorm2d (eval, folded)

    # ---- Stage 1: one big im2col GEMM over all 4 pool positions ----
    m1 = p1_ref.shape[0] // 4
    y1 = jnp.dot(p1_ref[...], w1_ref[...], preferred_element_type=f32)
    x1 = bias_relu_pool_bn(y1, bns1_ref, m1)               # (m1, C_PAD)

    # ---- Stages 2 & 3: conv via (X @ W_tap) + static 0/1 selection matmuls ----
    def conv_stage(x_prev, s_ref, w_ref, bns_ref):
        m = s_ref.shape[1] // 4
        acc = None
        for kk in range(4):  # static unroll over the 2x2 kernel taps
            t = jnp.dot(x_prev, w_ref[kk], preferred_element_type=f32)
            term = jnp.dot(s_ref[kk], t, preferred_element_type=f32)
            acc = term if acc is None else acc + term
        return bias_relu_pool_bn(acc, bns_ref, m)

    x2 = conv_stage(x1, s2_ref, w2_ref, bns2_ref)          # (B*4, C_PAD)
    x3 = conv_stage(x2, s3_ref, w3_ref, bns3_ref)          # (B,   C_PAD); cols 0:64 valid

    # ---- fc1 head (final spatial is 1x1, so flatten == channel vector) ----
    h = jnp.dot(x3, wf1_ref[...], preferred_element_type=f32) + bf1_ref[...]
    h = jnp.maximum(h, 0.0)
    # TODO(synk): Dropout(p=0.5) is identity in eval mode; train-mode RNG masking not implemented.
    h = jnp.dot(h, wf2_ref[...], preferred_element_type=f32) + bf2_ref[...]
    h = jax.nn.sigmoid(h)
    o_ref[...] = jnp.dot(h, wf3_ref[...], preferred_element_type=f32) + bf3_ref[...]


# ----------------------------------------------------------------------------
# Wrapper-side preprocessing (pure data movement / constants, folded under jit)
# ----------------------------------------------------------------------------
def extract_pooled_patches(x_nhwc, pad=2, k=2, stride=2, pool=2):
    """Stage-1 im2col: (pool*pool, B*Hp*Wp, k*k*C) patches, last axis ordered (kh, kw, C)."""
    B, H, W, C = x_nhwc.shape
    xp = jnp.pad(x_nhwc, ((0, 0), (pad, pad), (pad, pad), (0, 0)))
    Ho = (H + 2 * pad - k) // stride + 1
    Wo = (W + 2 * pad - k) // stride + 1
    Hp, Wp = Ho // pool, Wo // pool
    rows = []
    for kh in range(k):
        cols = []
        for kw in range(k):
            sl = xp[:, kh:kh + stride * Ho:stride, kw:kw + stride * Wo:stride, :]
            cols.append(sl)                      # (B, Ho, Wo, C)
        rows.append(jnp.stack(cols, axis=3))     # (B, Ho, Wo, kw, C)
    patches = jnp.stack(rows, axis=3)            # (B, Ho, Wo, kh, kw, C)
    patches = patches[:, :Hp * pool, :Wp * pool]  # MaxPool floor-mode crop
    patches = patches.reshape(B, Hp, pool, Wp, pool, k, k, C)
    patches = patches.transpose(2, 4, 0, 1, 3, 5, 6, 7)   # (ph, pw, B, Hp, Wp, kh, kw, C)
    patches = patches.reshape(pool * pool, B * Hp * Wp, k * k * C)
    return patches, (B, Hp, Wp)


def selection_matrices(B, h_in, w_in, h_out, w_out, src_pad):
    """Static 0/1 matrices that turn the stage's im2col gather into matmuls.

    S[kh*2+kw, p*M + (b*h_out*w_out + hp*w_out + wp), b*h_in*w_in + hi*w_in + wi] = 1,
    where p = ph*2+pw enumerates the 2x2 max-pool window and (hi, wi) is the
    (stride-2, pad-2) conv source pixel; out-of-range sources (zero padding)
    simply leave an all-zero row.
    """
    M = B * h_out * w_out
    S = np.zeros((4, 4 * M, src_pad), np.float32)
    for kh in range(2):
        for kw in range(2):
            kk = kh * 2 + kw
            for ph in range(2):
                for pw in range(2):
                    p = ph * 2 + pw
                    for b in range(B):
                        for hp in range(h_out):
                            for wp in range(w_out):
                                hi = 4 * hp + 2 * ph + kh - 2
                                wi = 4 * wp + 2 * pw + kw - 2
                                if 0 <= hi < h_in and 0 <= wi < w_in:
                                    r = p * M + b * h_out * w_out + hp * w_out + wp
                                    c = b * h_in * w_in + hi * w_in + wi
                                    S[kk, r, c] = 1.0
    return jnp.asarray(S)


def _pack_bn(conv_b, gamma, beta, rmean, rvar):
    scale = gamma / jnp.sqrt(rvar + 1e-5)
    shift = beta - rmean * scale
    pad = lambda v: jnp.pad(v.astype(jnp.float32), (0, C_PAD - v.shape[0]))
    return jnp.stack([pad(conv_b), pad(scale), pad(shift)], axis=0)   # (3, C_PAD)


def _pack_conv_w_im2col(conv_w, k_pad):
    # (Cout, Cin, 2, 2) -> (k_pad, C_PAD), row order (kh, kw, ci).
    cout, cin = conv_w.shape[0], conv_w.shape[1]
    w = jnp.transpose(conv_w, (2, 3, 1, 0)).reshape(4 * cin, cout).astype(jnp.float32)
    return jnp.pad(w, ((0, k_pad - 4 * cin), (0, C_PAD - cout)))


def _pack_conv_w_taps(conv_w):
    # (Cout, Cin, 2, 2) -> (4, C_PAD, C_PAD) with [kh*2+kw, ci, co].
    cout, cin = conv_w.shape[0], conv_w.shape[1]
    w = jnp.transpose(conv_w, (2, 3, 1, 0)).reshape(4, cin, cout).astype(jnp.float32)
    return jnp.pad(w, ((0, 0), (0, C_PAD - cin), (0, C_PAD - cout)))


def _conv_pool_out(h):  # Conv2d(k=2,s=2,p=2) then MaxPool2d(2), floor mode
    return ((h + 2) // 2 + 1) // 2


def forward_once_fused(x_nchw, params):
    (cw1, cb1, g1, be1, rm1, rv1), (cw2, cb2, g2, be2, rm2, rv2), \
        (cw3, cb3, g3, be3, rm3, rv3) = params["stages"]
    (fw1, fb1), (fw2, fb2), (fw3, fb3) = params["fc"]

    B = x_nchw.shape[0]
    x = jnp.transpose(x_nchw, (0, 2, 3, 1)).astype(jnp.float32)   # NCHW -> NHWC

    # Stage-1 im2col in the wrapper (depends only on the raw input).
    patches, (_, hp1, wp1) = extract_pooled_patches(x)            # (4, B*25, 88)
    m1, k1 = patches.shape[1], patches.shape[2]
    m1p = _round_up(m1, 128)     # sublane pad for P1 / lane pad for S2
    k1p = _round_up(k1, 128)
    p1 = jnp.pad(patches, ((0, 0), (0, m1p - m1), (0, k1p - k1)))
    p1 = p1.reshape(4 * m1p, k1p)                                  # pool-position-major rows

    # Geometry: 16 -> 10 -> 5 -> 4 -> 2 -> 3 -> 1 (final 1x1x64 feeds Linear(64, 32)).
    hp2, wp2 = _conv_pool_out(hp1), _conv_pool_out(wp1)
    hp3, wp3 = _conv_pool_out(hp2), _conv_pool_out(wp2)
    assert hp3 == 1 and wp3 == 1

    s2 = selection_matrices(B, hp1, wp1, hp2, wp2, src_pad=m1p)            # (4, 4*B*4, m1p)
    s3 = selection_matrices(B, hp2, wp2, hp3, wp3, src_pad=B * hp2 * wp2)  # (4, 4*B, B*4)

    w1m = _pack_conv_w_im2col(cw1, k1p)
    w2t = _pack_conv_w_taps(cw2)
    w3t = _pack_conv_w_taps(cw3)
    bns1 = _pack_bn(cb1, g1, be1, rm1, rv1)
    bns2 = _pack_bn(cb2, g2, be2, rm2, rv2)
    bns3 = _pack_bn(cb3, g3, be3, rm3, rv3)

    # FC head: PyTorch Linear weight is (out, in) -> (in, out); pad fc1's input dim
    # to C_PAD so it consumes the padded feature slab directly (padded cols are 0).
    wf1 = jnp.pad(fw1.T.astype(jnp.float32), ((0, C_PAD - fw1.shape[1]), (0, 0)))
    wf2 = fw2.T.astype(jnp.float32)
    wf3 = fw3.T.astype(jnp.float32)
    row = lambda v: v.reshape(1, -1).astype(jnp.float32)

    # Single kernel launch; no grid -> whole (tiny) operands live in VMEM.
    return pl.pallas_call(
        siamese_fused_kernel,
        out_shape=jax.ShapeDtypeStruct((B, 4), jnp.float32),
    )(p1, w1m, bns1, s2, w2t, bns2, s3, w3t, bns3,
      wf1, row(fb1), wf2, row(fb2), wf3, row(fb3))


def siamese_forward(input1, input2, params):
    # Batch both Siamese branches through one fused kernel launch; split at the end.
    x = jnp.concatenate([input1, input2], axis=0)
    out = forward_once_fused(x, params)
    b = input1.shape[0]
    return out[:b], out[b:]


# ----------------------------------------------------------------------------
# Parameter init (deterministic, mirroring the module's __init__ shapes)
# ----------------------------------------------------------------------------
def init_params(key):
    def uniform(key, shape, fan_in):
        bound = 1.0 / jnp.sqrt(float(fan_in))
        return jax.random.uniform(key, shape, jnp.float32, -bound, bound)

    keys = jax.random.split(key, 12)
    stages = []
    specs = [(22, 16), (16, 32), (32, 64)]  # (Cin, Cout) for cnn1 convs (k=2)
    for s, (cin, cout) in enumerate(specs):
        kw_, kb_ = keys[2 * s], keys[2 * s + 1]
        fan_in = cin * 2 * 2
        conv_w = uniform(kw_, (cout, cin, 2, 2), fan_in)
        conv_b = uniform(kb_, (cout,), fan_in)
        # BatchNorm2d fresh init (eval mode): gamma=1, beta=0, mean=0, var=1.
        gamma = jnp.ones((cout,), jnp.float32)
        beta = jnp.zeros((cout,), jnp.float32)
        rmean = jnp.zeros((cout,), jnp.float32)
        rvar = jnp.ones((cout,), jnp.float32)
        stages.append((conv_w, conv_b, gamma, beta, rmean, rvar))

    fc = []
    fc_specs = [(64, 32), (32, 32), (32, 4)]
    for s, (fin, fout) in enumerate(fc_specs):
        kw_, kb_ = keys[6 + 2 * s], keys[6 + 2 * s + 1]
        fc.append((uniform(kw_, (fout, fin), fin), uniform(kb_, (fout,), fin)))

    return {"stages": stages, "fc": fc}


if __name__ == "__main__":
    key = jax.random.PRNGKey(0)
    kp, k1, k2 = jax.random.split(key, 3)
    params = init_params(kp)

    # Input 16x16 -> conv/pool chain ends at 1x1x64, matching Linear(64, ...).
    input1 = jax.random.normal(k1, (2, 22, 16, 16), jnp.float32)  # NCHW
    input2 = jax.random.normal(k2, (2, 22, 16, 16), jnp.float32)  # NCHW

    out1, out2 = jax.jit(lambda a, b: siamese_forward(a, b, params))(input1, input2)
    jax.block_until_ready((out1, out2))
    assert out1.shape == (2, 4) and out2.shape == (2, 4)
    print("KERNEL_OK")
</pallas_src>

<mosaic_0001>
module attributes {stable_mosaic.version = 11 : i64} {
  func.func @siamese_fused_kernel(%arg0: memref<512x128xf32, #tpu.memory_space<vmem>>, %arg1: memref<128x128xf32, #tpu.memory_space<vmem>>, %arg2: memref<3x128xf32, #tpu.memory_space<vmem>>, %arg3: memref<4x64x128xf32, #tpu.memory_space<vmem>>, %arg4: memref<4x128x128xf32, #tpu.memory_space<vmem>>, %arg5: memref<3x128xf32, #tpu.memory_space<vmem>>, %arg6: memref<4x16x16xf32, #tpu.memory_space<vmem>>, %arg7: memref<4x128x128xf32, #tpu.memory_space<vmem>>, %arg8: memref<3x128xf32, #tpu.memory_space<vmem>>, %arg9: memref<128x32xf32, #tpu.memory_space<vmem>>, %arg10: memref<1x32xf32, #tpu.memory_space<vmem>>, %arg11: memref<32x32xf32, #tpu.memory_space<vmem>>, %arg12: memref<1x32xf32, #tpu.memory_space<vmem>>, %arg13: memref<32x4xf32, #tpu.memory_space<vmem>>, %arg14: memref<1x4xf32, #tpu.memory_space<vmem>>, %arg15: memref<4x4xf32, #tpu.memory_space<vmem>>) attributes {dimension_semantics = [], scalar_prefetch = 0 : i64, scratch_operands = 0 : i64, tpu.core_type = #tpu.core_type<tc>} {
    %c0 = arith.constant 0 : index
    %c0_0 = arith.constant 0 : index
    %0 = vector.load %arg0[%c0, %c0_0] : memref<512x128xf32, #tpu.memory_space<vmem>>, vector<512x128xf32>
    %c0_1 = arith.constant 0 : index
    %c0_2 = arith.constant 0 : index
    %1 = vector.load %arg1[%c0_1, %c0_2] : memref<128x128xf32, #tpu.memory_space<vmem>>, vector<128x128xf32>
    %cst = arith.constant dense<0.000000e+00> : vector<512x128xf32>
    %2 = tpu.matmul %0, %1, %cst {dimension_numbers = #tpu.dot_dimension_numbers<[1], [0], [0], [1], [0, 0, 1, 1], [], []>} : vector<512x128xf32>, vector<128x128xf32>, vector<512x128xf32> -> vector<512x128xf32>
    %c0_3 = arith.constant 0 : index
    %c0_4 = arith.constant 0 : index
    %3 = vector.load %arg2[%c0_3, %c0_4] : memref<3x128xf32, #tpu.memory_space<vmem>>, vector<1x128xf32>
    %4 = vector.broadcast %3 : vector<1x128xf32> to vector<512x128xf32>
    %5 = arith.addf %2, %4 : vector<512x128xf32>
    %cst_5 = arith.constant 0.000000e+00 : f32
    %6 = vector.broadcast %cst_5 : f32 to vector<512x128xf32>
    %7 = arith.maximumf %5, %6 : vector<512x128xf32>
    %8 = vector.extract_strided_slice %7 {offsets = [0, 0], sizes = [128, 128], strides = [1, 1]} : vector<512x128xf32> to vector<128x128xf32>
    %9 = vector.extract_strided_slice %7 {offsets = [128, 0], sizes = [128, 128], strides = [1, 1]} : vector<512x128xf32> to vector<128x128xf32>
    %10 = arith.maximumf %8, %9 : vector<128x128xf32>
    %11 = vector.extract_strided_slice %7 {offsets = [256, 0], sizes = [128, 128], strides = [1, 1]} : vector<512x128xf32> to vector<128x128xf32>
    %12 = vector.extract_strided_slice %7 {offsets = [384, 0], sizes = [128, 128], strides = [1, 1]} : vector<512x128xf32> to vector<128x128xf32>
    %13 = arith.maximumf %11, %12 : vector<128x128xf32>
    %14 = arith.maximumf %10, %13 : vector<128x128xf32>
    %c1 = arith.constant 1 : index
    %c0_6 = arith.constant 0 : index
    %15 = vector.load %arg2[%c1, %c0_6] : memref<3x128xf32, #tpu.memory_space<vmem>>, vector<1x128xf32>
    %16 = vector.broadcast %15 : vector<1x128xf32> to vector<128x128xf32>
    %17 = arith.mulf %14, %16 : vector<128x128xf32>
    %c2 = arith.constant 2 : index
    %c0_7 = arith.constant 0 : index
    %18 = vector.load %arg2[%c2, %c0_7] : memref<3x128xf32, #tpu.memory_space<vmem>>, vector<1x128xf32>
    %19 = vector.broadcast %18 : vector<1x128xf32> to vector<128x128xf32>
    %20 = arith.addf %17, %19 : vector<128x128xf32>
    %c0_8 = arith.constant 0 : index
    %c0_9 = arith.constant 0 : index
    %c0_10 = arith.constant 0 : index
    %21 = vector.load %arg4[%c0_8, %c0_9, %c0_10] : memref<4x128x128xf32, #tpu.memory_space<vmem>>, vector<1x128x128xf32>
    %22 = vector.shape_cast %21 : vector<1x128x128xf32> to vector<128x128xf32>
    %cst_11 = arith.constant dense<0.000000e+00> : vector<128x128xf32>
    %23 = tpu.matmul %20, %22, %cst_11 {dimension_numbers = #tpu.dot_dimension_numbers<[1], [0], [0], [1], [0, 0, 1, 1], [], []>} : vector<128x128xf32>, vector<128x128xf32>, vector<128x128xf32> -> vector<128x128xf32>
    %c0_12 = arith.constant 0 : index
    %c0_13 = arith.constant 0 : index
    %c0_14 = arith.constant 0 : index
    %24 = vector.load %arg3[%c0_12, %c0_13, %c0_14] : memref<4x64x128xf32, #tpu.memory_space<vmem>>, vector<1x64x128xf32>
    %25 = vector.shape_cast %24 : vector<1x64x128xf32> to vector<64x128xf32>
    %cst_15 = arith.constant dense<0.000000e+00> : vector<64x128xf32>
    %26 = tpu.matmul %25, %23, %cst_15 {dimension_numbers = #tpu.dot_dimension_numbers<[1], [0], [0], [1], [0, 0, 1, 1], [], []>} : vector<64x128xf32>, vector<128x128xf32>, vector<64x128xf32> -> vector<64x128xf32>
    %c1_16 = arith.constant 1 : index
    %c0_17 = arith.constant 0 : index
    %c0_18 = arith.constant 0 : index
    %27 = vector.load %arg4[%c1_16, %c0_17, %c0_18] : memref<4x128x128xf32, #tpu.memory_space<vmem>>, vector<1x128x128xf32>
    %28 = vector.shape_cast %27 : vector<1x128x128xf32> to vector<128x128xf32>
    %cst_19 = arith.constant dense<0.000000e+00> : vector<128x128xf32>
    %29 = tpu.matmul %20, %28, %cst_19 {dimension_numbers = #tpu.dot_dimension_numbers<[1], [0], [0], [1], [0, 0, 1, 1], [], []>} : vector<128x128xf32>, vector<128x128xf32>, vector<128x128xf32> -> vector<128x128xf32>
    %c1_20 = arith.constant 1 : index
    %c0_21 = arith.constant 0 : index
    %c0_22 = arith.constant 0 : index
    %30 = vector.load %arg3[%c1_20, %c0_21, %c0_22] : memref<4x64x128xf32, #tpu.memory_space<vmem>>, vector<1x64x128xf32>
    %31 = vector.shape_cast %30 : vector<1x64x128xf32> to vector<64x128xf32>
    %cst_23 = arith.constant dense<0.000000e+00> : vector<64x128xf32>
    %32 = tpu.matmul %31, %29, %cst_23 {dimension_numbers = #tpu.dot_dimension_numbers<[1], [0], [0], [1], [0, 0, 1, 1], [], []>} : vector<64x128xf32>, vector<128x128xf32>, vector<64x128xf32> -> vector<64x128xf32>
    %33 = arith.addf %26, %32 : vector<64x128xf32>
    %c2_24 = arith.constant 2 : index
    %c0_25 = arith.constant 0 : index
    %c0_26 = arith.constant 0 : index
    %34 = vector.load %arg4[%c2_24, %c0_25, %c0_26] : memref<4x128x128xf32, #tpu.memory_space<vmem>>, vector<1x128x128xf32>
    %35 = vector.shape_cast %34 : vector<1x128x128xf32> to vector<128x128xf32>
    %cst_27 = arith.constant dense<0.000000e+00> : vector<128x128xf32>
    %36 = tpu.matmul %20, %35, %cst_27 {dimension_numbers = #tpu.dot_dimension_numbers<[1], [0], [0], [1], [0, 0, 1, 1], [], []>} : vector<128x128xf32>, vector<128x128xf32>, vector<128x128xf32> -> vector<128x128xf32>
    %c2_28 = arith.constant 2 : index
    %c0_29 = arith.constant 0 : index
    %c0_30 = arith.constant 0 : index
    %37 = vector.load %arg3[%c2_28, %c0_29, %c0_30] : memref<4x64x128xf32, #tpu.memory_space<vmem>>, vector<1x64x128xf32>
    %38 = vector.shape_cast %37 : vector<1x64x128xf32> to vector<64x128xf32>
    %cst_31 = arith.constant dense<0.000000e+00> : vector<64x128xf32>
    %39 = tpu.matmul %38, %36, %cst_31 {dimension_numbers = #tpu.dot_dimension_numbers<[1], [0], [0], [1], [0, 0, 1, 1], [], []>} : vector<64x128xf32>, vector<128x128xf32>, vector<64x128xf32> -> vector<64x128xf32>
    %40 = arith.addf %33, %39 : vector<64x128xf32>
    %c3 = arith.constant 3 : index
    %c0_32 = arith.constant 0 : index
    %c0_33 = arith.constant 0 : index
    %41 = vector.load %arg4[%c3, %c0_32, %c0_33] : memref<4x128x128xf32, #tpu.memory_space<vmem>>, vector<1x128x128xf32>
    %42 = vector.shape_cast %41 : vector<1x128x128xf32> to vector<128x128xf32>
    %cst_34 = arith.constant dense<0.000000e+00> : vector<128x128xf32>
    %43 = tpu.matmul %20, %42, %cst_34 {dimension_numbers = #tpu.dot_dimension_numbers<[1], [0], [0], [1], [0, 0, 1, 1], [], []>} : vector<128x128xf32>, vector<128x128xf32>, vector<128x128xf32> -> vector<128x128xf32>
    %c3_35 = arith.constant 3 : index
    %c0_36 = arith.constant 0 : index
    %c0_37 = arith.constant 0 : index
    %44 = vector.load %arg3[%c3_35, %c0_36, %c0_37] : memref<4x64x128xf32, #tpu.memory_space<vmem>>, vector<1x64x128xf32>
    %45 = vector.shape_cast %44 : vector<1x64x128xf32> to vector<64x128xf32>
    %cst_38 = arith.constant dense<0.000000e+00> : vector<64x128xf32>
    %46 = tpu.matmul %45, %43, %cst_38 {dimension_numbers = #tpu.dot_dimension_numbers<[1], [0], [0], [1], [0, 0, 1, 1], [], []>} : vector<64x128xf32>, vector<128x128xf32>, vector<64x128xf32> -> vector<64x128xf32>
    %47 = arith.addf %40, %46 : vector<64x128xf32>
    %c0_39 = arith.constant 0 : index
    %c0_40 = arith.constant 0 : index
    %48 = vector.load %arg5[%c0_39, %c0_40] : memref<3x128xf32, #tpu.memory_space<vmem>>, vector<1x128xf32>
    %49 = vector.broadcast %48 : vector<1x128xf32> to vector<64x128xf32>
    %50 = arith.addf %47, %49 : vector<64x128xf32>
    %cst_41 = arith.constant 0.000000e+00 : f32
    %51 = vector.broadcast %cst_41 : f32 to vector<64x128xf32>
    %52 = arith.maximumf %50, %51 : vector<64x128xf32>
    %53 = vector.extract_strided_slice %52 {offsets = [0, 0], sizes = [16, 128], strides = [1, 1]} : vector<64x128xf32> to vector<16x128xf32>
    %54 = vector.extract_strided_slice %52 {offsets = [16, 0], sizes = [16, 128], strides = [1, 1]} : vector<64x128xf32> to vector<16x128xf32>
    %55 = arith.maximumf %53, %54 : vector<16x128xf32>
    %56 = vector.extract_strided_slice %52 {offsets = [32, 0], sizes = [16, 128], strides = [1, 1]} : vector<64x128xf32> to vector<16x128xf32>
    %57 = vector.extract_strided_slice %52 {offsets = [48, 0], sizes = [16, 128], strides = [1, 1]} : vector<64x128xf32> to vector<16x128xf32>
    %58 = arith.maximumf %56, %57 : vector<16x128xf32>
    %59 = arith.maximumf %55, %58 : vector<16x128xf32>
    %c1_42 = arith.constant 1 : index
    %c0_43 = arith.constant 0 : index
    %60 = vector.load %arg5[%c1_42, %c0_43] : memref<3x128xf32, #tpu.memory_space<vmem>>, vector<1x128xf32>
    %61 = vector.broadcast %60 : vector<1x128xf32> to vector<16x128xf32>
    %62 = arith.mulf %59, %61 : vector<16x128xf32>
    %c2_44 = arith.constant 2 : index
    %c0_45 = arith.constant 0 : index
    %63 = vector.load %arg5[%c2_44, %c0_45] : memref<3x128xf32, #tpu.memory_space<vmem>>, vector<1x128xf32>
    %64 = vector.broadcast %63 : vector<1x128xf32> to vector<16x128xf32>
    %65 = arith.addf %62, %64 : vector<16x128xf32>
    %c0_46 = arith.constant 0 : index
    %c0_47 = arith.constant 0 : index
    %c0_48 = arith.constant 0 : index
    %66 = vector.load %arg7[%c0_46, %c0_47, %c0_48] : memref<4x128x128xf32, #tpu.memory_space<vmem>>, vector<1x128x128xf32>
    %67 = vector.shape_cast %66 : vector<1x128x128xf32> to vector<128x128xf32>
    %cst_49 = arith.constant dense<0.000000e+00> : vector<16x128xf32>
    %68 = tpu.matmul %65, %67, %cst_49 {dimension_numbers = #tpu.dot_dimension_numbers<[1], [0], [0], [1], [0, 0, 1, 1], [], []>} : vector<16x128xf32>, vector<128x128xf32>, vector<16x128xf32> -> vector<16x128xf32>
    %c0_50 = arith.constant 0 : index
    %c0_51 = arith.constant 0 : index
    %c0_52 = arith.constant 0 : index
    %69 = vector.load %arg6[%c0_50, %c0_51, %c0_52] : memref<4x16x16xf32, #tpu.memory_space<vmem>>, vector<1x16x16xf32>
    %70 = vector.shape_cast %69 : vector<1x16x16xf32> to vector<16x16xf32>
    %cst_53 = arith.constant dense<0.000000e+00> : vector<16x128xf32>
    %71 = tpu.matmul %70, %68, %cst_53 {dimension_numbers = #tpu.dot_dimension_numbers<[1], [0], [0], [1], [0, 0, 1, 1], [], []>} : vector<16x16xf32>, vector<16x128xf32>, vector<16x128xf32> -> vector<16x128xf32>
    %c1_54 = arith.constant 1 : index
    %c0_55 = arith.constant 0 : index
    %c0_56 = arith.constant 0 : index
    %72 = vector.load %arg7[%c1_54, %c0_55, %c0_56] : memref<4x128x128xf32, #tpu.memory_space<vmem>>, vector<1x128x128xf32>
    %73 = vector.shape_cast %72 : vector<1x128x128xf32> to vector<128x128xf32>
    %cst_57 = arith.constant dense<0.000000e+00> : vector<16x128xf32>
    %74 = tpu.matmul %65, %73, %cst_57 {dimension_numbers = #tpu.dot_dimension_numbers<[1], [0], [0], [1], [0, 0, 1, 1], [], []>} : vector<16x128xf32>, vector<128x128xf32>, vector<16x128xf32> -> vector<16x128xf32>
    %c1_58 = arith.constant 1 : index
    %c0_59 = arith.constant 0 : index
    %c0_60 = arith.constant 0 : index
    %75 = vector.load %arg6[%c1_58, %c0_59, %c0_60] : memref<4x16x16xf32, #tpu.memory_space<vmem>>, vector<1x16x16xf32>
    %76 = vector.shape_cast %75 : vector<1x16x16xf32> to vector<16x16xf32>
    %cst_61 = arith.constant dense<0.000000e+00> : vector<16x128xf32>
    %77 = tpu.matmul %76, %74, %cst_61 {dimension_numbers = #tpu.dot_dimension_numbers<[1], [0], [0], [1], [0, 0, 1, 1], [], []>} : vector<16x16xf32>, vector<16x128xf32>, vector<16x128xf32> -> vector<16x128xf32>
    %78 = arith.addf %71, %77 : vector<16x128xf32>
    %c2_62 = arith.constant 2 : index
    %c0_63 = arith.constant 0 : index
    %c0_64 = arith.constant 0 : index
    %79 = vector.load %arg7[%c2_62, %c0_63, %c0_64] : memref<4x128x128xf32, #tpu.memory_space<vmem>>, vector<1x128x128xf32>
    %80 = vector.shape_cast %79 : vector<1x128x128xf32> to vector<128x128xf32>
    %cst_65 = arith.constant dense<0.000000e+00> : vector<16x128xf32>
    %81 = tpu.matmul %65, %80, %cst_65 {dimension_numbers = #tpu.dot_dimension_numbers<[1], [0], [0], [1], [0, 0, 1, 1], [], []>} : vector<16x128xf32>, vector<128x128xf32>, vector<16x128xf32> -> vector<16x128xf32>
    %c2_66 = arith.constant 2 : index
    %c0_67 = arith.constant 0 : index
    %c0_68 = arith.constant 0 : index
    %82 = vector.load %arg6[%c2_66, %c0_67, %c0_68] : memref<4x16x16xf32, #tpu.memory_space<vmem>>, vector<1x16x16xf32>
    %83 = vector.shape_cast %82 : vector<1x16x16xf32> to vector<16x16xf32>
    %cst_69 = arith.constant dense<0.000000e+00> : vector<16x128xf32>
    %84 = tpu.matmul %83, %81, %cst_69 {dimension_numbers = #tpu.dot_dimension_numbers<[1], [0], [0], [1], [0, 0, 1, 1], [], []>} : vector<16x16xf32>, vector<16x128xf32>, vector<16x128xf32> -> vector<16x128xf32>
    %85 = arith.addf %78, %84 : vector<16x128xf32>
    %c3_70 = arith.constant 3 : index
    %c0_71 = arith.constant 0 : index
    %c0_72 = arith.constant 0 : index
    %86 = vector.load %arg7[%c3_70, %c0_71, %c0_72] : memref<4x128x128xf32, #tpu.memory_space<vmem>>, vector<1x128x128xf32>
    %87 = vector.shape_cast %86 : vector<1x128x128xf32> to vector<128x128xf32>
    %cst_73 = arith.constant dense<0.000000e+00> : vector<16x128xf32>
    %88 = tpu.matmul %65, %87, %cst_73 {dimension_numbers = #tpu.dot_dimension_numbers<[1], [0], [0], [1], [0, 0, 1, 1], [], []>} : vector<16x128xf32>, vector<128x128xf32>, vector<16x128xf32> -> vector<16x128xf32>
    %c3_74 = arith.constant 3 : index
    %c0_75 = arith.constant 0 : index
    %c0_76 = arith.constant 0 : index
    %89 = vector.load %arg6[%c3_74, %c0_75, %c0_76] : memref<4x16x16xf32, #tpu.memory_space<vmem>>, vector<1x16x16xf32>
    %90 = vector.shape_cast %89 : vector<1x16x16xf32> to vector<16x16xf32>
    %cst_77 = arith.constant dense<0.000000e+00> : vector<16x128xf32>
    %91 = tpu.matmul %90, %88, %cst_77 {dimension_numbers = #tpu.dot_dimension_numbers<[1], [0], [0], [1], [0, 0, 1, 1], [], []>} : vector<16x16xf32>, vector<16x128xf32>, vector<16x128xf32> -> vector<16x128xf32>
    %92 = arith.addf %85, %91 : vector<16x128xf32>
    %c0_78 = arith.constant 0 : index
    %c0_79 = arith.constant 0 : index
    %93 = vector.load %arg8[%c0_78, %c0_79] : memref<3x128xf32, #tpu.memory_space<vmem>>, vector<1x128xf32>
    %94 = vector.broadcast %93 : vector<1x128xf32> to vector<16x128xf32>
    %95 = arith.addf %92, %94 : vector<16x128xf32>
    %cst_80 = arith.constant 0.000000e+00 : f32
    %96 = vector.broadcast %cst_80 : f32 to vector<16x128xf32>
    %97 = arith.maximumf %95, %96 : vector<16x128xf32>
    %98 = vector.extract_strided_slice %97 {offsets = [0, 0], sizes = [4, 128], strides = [1, 1]} : vector<16x128xf32> to vector<4x128xf32>
    %99 = vector.extract_strided_slice %97 {offsets = [4, 0], sizes = [4, 128], strides = [1, 1]} : vector<16x128xf32> to vector<4x128xf32>
    %100 = arith.maximumf %98, %99 : vector<4x128xf32>
    %101 = vector.extract_strided_slice %97 {offsets = [8, 0], sizes = [4, 128], strides = [1, 1]} : vector<16x128xf32> to vector<4x128xf32>
    %102 = vector.extract_strided_slice %97 {offsets = [12, 0], sizes = [4, 128], strides = [1, 1]} : vector<16x128xf32> to vector<4x128xf32>
    %103 = arith.maximumf %101, %102 : vector<4x128xf32>
    %104 = arith.maximumf %100, %103 : vector<4x128xf32>
    %c1_81 = arith.constant 1 : index
    %c0_82 = arith.constant 0 : index
    %105 = vector.load %arg8[%c1_81, %c0_82] : memref<3x128xf32, #tpu.memory_space<vmem>>, vector<1x128xf32>
    %106 = vector.broadcast %105 : vector<1x128xf32> to vector<4x128xf32>
    %107 = arith.mulf %104, %106 : vector<4x128xf32>
    %c2_83 = arith.constant 2 : index
    %c0_84 = arith.constant 0 : index
    %108 = vector.load %arg8[%c2_83, %c0_84] : memref<3x128xf32, #tpu.memory_space<vmem>>, vector<1x128xf32>
    %109 = vector.broadcast %108 : vector<1x128xf32> to vector<4x128xf32>
    %110 = arith.addf %107, %109 : vector<4x128xf32>
    %c0_85 = arith.constant 0 : index
    %c0_86 = arith.constant 0 : index
    %111 = vector.load %arg9[%c0_85, %c0_86] : memref<128x32xf32, #tpu.memory_space<vmem>>, vector<128x32xf32>
    %cst_87 = arith.constant dense<0.000000e+00> : vector<4x32xf32>
    %112 = tpu.matmul %110, %111, %cst_87 {dimension_numbers = #tpu.dot_dimension_numbers<[1], [0], [0], [1], [0, 0, 1, 1], [], []>} : vector<4x128xf32>, vector<128x32xf32>, vector<4x32xf32> -> vector<4x32xf32>
    %c0_88 = arith.constant 0 : index
    %c0_89 = arith.constant 0 : index
    %113 = vector.load %arg10[%c0_88, %c0_89] : memref<1x32xf32, #tpu.memory_space<vmem>>, vector<1x32xf32>
    %114 = vector.broadcast %113 : vector<1x32xf32> to vector<4x32xf32>
    %115 = arith.addf %112, %114 : vector<4x32xf32>
    %cst_90 = arith.constant 0.000000e+00 : f32
    %116 = vector.broadcast %cst_90 : f32 to vector<4x32xf32>
    %117 = arith.maximumf %115, %116 : vector<4x32xf32>
    %c0_91 = arith.constant 0 : index
    %c0_92 = arith.constant 0 : index
    %118 = vector.load %arg11[%c0_91, %c0_92] : memref<32x32xf32, #tpu.memory_space<vmem>>, vector<32x32xf32>
    %cst_93 = arith.constant dense<0.000000e+00> : vector<4x32xf32>
    %119 = tpu.matmul %117, %118, %cst_93 {dimension_numbers = #tpu.dot_dimension_numbers<[1], [0], [0], [1], [0, 0, 1, 1], [], []>} : vector<4x32xf32>, vector<32x32xf32>, vector<4x32xf32> -> vector<4x32xf32>
    %c0_94 = arith.constant 0 : index
    %c0_95 = arith.constant 0 : index
    %120 = vector.load %arg12[%c0_94, %c0_95] : memref<1x32xf32, #tpu.memory_space<vmem>>, vector<1x32xf32>
    %121 = vector.broadcast %120 : vector<1x32xf32> to vector<4x32xf32>
    %122 = arith.addf %119, %121 : vector<4x32xf32>
    %123 = arith.negf %122 : vector<4x32xf32>
    %124 = math.exp %123 : vector<4x32xf32>
    %cst_96 = arith.constant 1.000000e+00 : f32
    %125 = vector.broadcast %cst_96 : f32 to vector<4x32xf32>
    %126 = arith.addf %125, %124 : vector<4x32xf32>
    %127 = arith.divf %125, %126 : vector<4x32xf32>
    %c0_97 = arith.constant 0 : index
    %c0_98 = arith.constant 0 : index
    %128 = vector.load %arg13[%c0_97, %c0_98] : memref<32x4xf32, #tpu.memory_space<vmem>>, vector<32x4xf32>
    %cst_99 = arith.constant dense<0.000000e+00> : vector<4x4xf32>
    %129 = tpu.matmul %127, %128, %cst_99 {dimension_numbers = #tpu.dot_dimension_numbers<[1], [0], [0], [1], [0, 0, 1, 1], [], []>} : vector<4x32xf32>, vector<32x4xf32>, vector<4x4xf32> -> vector<4x4xf32>
    %c0_100 = arith.constant 0 : index
    %c0_101 = arith.constant 0 : index
    %130 = vector.load %arg14[%c0_100, %c0_101] : memref<1x4xf32, #tpu.memory_space<vmem>>, vector<1x4xf32>
    %131 = vector.broadcast %130 : vector<1x4xf32> to vector<4x4xf32>
    %132 = arith.addf %129, %131 : vector<4x4xf32>
    %c0_102 = arith.constant 0 : index
    %c0_103 = arith.constant 0 : index
    %133 = vector.load %arg15[%c0_102, %c0_103] : memref<4x4xf32, #tpu.memory_space<vmem>>, vector<4x4xf32>
    tpu.vector_store %arg15[%c0_102, %c0_103], %132 {strides = array<i32>} : memref<4x4xf32, #tpu.memory_space<vmem>>, vector<4x4xf32>,
    return
  }
}

</mosaic_0001>

<bundles_post_ra>
// kernel: sub.3
= control target key start
LH: loop header
LB: loop body
LE: loop exit
PB: predicated region body
PF: predicated region fallthrough
CT: control target
= control target key end

     0   :  { %s20_s0 = inlined_call_operand.<no memory space> [shape: f32[], index: 0, kind: input, shape index: {}]   ;;  %s21_s1 = inlined_call_operand.vmem [shape: f32[32], index: 1, kind: output, shape index: {}]  }
   0x1   :  { %v2_v0 = vstv %s20_s0 }
   0x2   :  { %3 = vst [vmem:[%s21_s1] sm:$0x1] %v2_v0 }

// kernel: sub.2
= control target key start
LH: loop header
LB: loop body
LE: loop exit
PB: predicated region body
PF: predicated region fallthrough
CT: control target
= control target key end

     0   :  { %s20_s0 = inlined_call_operand.<no memory space> [shape: f32[], index: 0, kind: input, shape index: {}]   ;;  %s21_s1 = inlined_call_operand.vmem [shape: f32[64], index: 1, kind: output, shape index: {}]  }
   0x1   :  { %v2_v0 = vstv %s20_s0 }
   0x2   :  { %3 = vst [vmem:[%s21_s1] sm:$0x1] %v2_v0 }

// kernel: _lambda_.1
= control target key start
LH: loop header
LB: loop body
LE: loop exit
PB: predicated region body
PF: predicated region fallthrough
CT: control target
= control target key end

     0   :  { %vm1147_vm0 = vcmask 130048   ;;  %vm1424_vm1 = vcmask 261120   ;;  %vm1498_vm6 = vcmask 27648   ;;  %s3096_s1 = inlined_call_operand.vmem [shape: f32[128,128], index: 1, kind: input, shape index: {}]   ;;  %s3097_s2 = inlined_call_operand.vmem [shape: f32[3,128], index: 2, kind: input, shape index: {}]   ;;  %s3098_s0 = inlined_call_operand.vmem [shape: f32[512,128], index: 0, kind: input, shape index: {}]   ;;  %s3099_s4 = inlined_call_operand.vmem [shape: f32[4,128,128], index: 4, kind: input, shape index: {}]   ;;  %s3100_s3 = inlined_call_operand.vmem [shape: f32[4,64,128], index: 3, kind: input, shape index: {}]   ;;  %s3101_s5 = inlined_call_operand.vmem [shape: f32[3,128], index: 5, kind: input, shape index: {}]   ;;  %s3102_s7 = inlined_call_operand.vmem [shape: f32[4,128,128], index: 7, kind: input, shape index: {}]   ;;  %s3103_s6 = inlined_call_operand.vmem [shape: f32[4,16,16], index: 6, kind: input, shape index: {}]   ;;  %s3104_s8 = inlined_call_operand.vmem [shape: f32[3,128], index: 8, kind: input, shape index: {}]   ;;  %s3105_s9 = inlined_call_operand.vmem [shape: f32[128,32], index: 9, kind: input, shape index: {}]   ;;  %s3106_s10 = inlined_call_operand.vmem [shape: f32[1,32], index: 10, kind: input, shape index: {}]   ;;  %s3107_s11 = inlined_call_operand.vmem [shape: f32[32,32], index: 11, kind: input, shape index: {}]   ;;  %s3108_s12 = inlined_call_operand.vmem [shape: f32[1,32], index: 12, kind: input, shape index: {}]   ;;  %s3109_s14 = inlined_call_operand.vmem [shape: f32[1,4], index: 14, kind: input, shape index: {}]   ;;  %s3110_s13 = inlined_call_operand.vmem [shape: f32[32,4], index: 13, kind: input, shape index: {}]   ;;  %s3111_s15 = inlined_call_operand.vmem [shape: f32[4,4], index: 15, kind: output, shape index: {}]  }
   0x1   :  { %v129_v0 = vld [vmem:[%s3096_s1 + $0x78] sm:$0xff]  ;;  %v128_v1 = vld [vmem:[%s3096_s1 + $0x70] sm:$0xff]  ;;  %v127_v2 = vld [vmem:[%s3096_s1 + $0x68] sm:$0xff] }
   0x2   :  { %132 = vmatpush.msra.mxu0 %v129_v0  ;;  %1642 = vmatpush.msra.mxu3 %v129_v0  ;;  %v126_v3 = vld [vmem:[%s3096_s1 + $0x60] sm:$0xff]  ;;  %v125_v4 = vld [vmem:[%s3096_s1 + $0x58] sm:$0xff]  ;;  %v124_v5 = vld [vmem:[%s3096_s1 + $0x50] sm:$0xff] }
   0x3   :  { %1641 = vmatpush.msra.mxu1 %v129_v0  ;;  %v123_v6 = vld [vmem:[%s3096_s1 + $0x48] sm:$0xff]  ;;  %v122_v7 = vld [vmem:[%s3096_s1 + $0x40] sm:$0xff]  ;;  %v121_v8 = vld [vmem:[%s3096_s1 + $0x38] sm:$0xff] }
   0x4   :  { %133 = vmatpush.msra.mxu0 %v128_v1  ;;  %1644 = vmatpush.msra.mxu3 %v128_v1  ;;  %v120_v9 = vld [vmem:[%s3096_s1 + $0x30] sm:$0xff]  ;;  %v119_v10 = vld [vmem:[%s3096_s1 + $0x28] sm:$0xff]  ;;  %v118_v11 = vld [vmem:[%s3096_s1 + $0x20] sm:$0xff] }
   0x5   :  { %1643 = vmatpush.msra.mxu1 %v128_v1  ;;  %v117_v12 = vld [vmem:[%s3096_s1 + $0x18] sm:$0xff]  ;;  %v116_v13 = vld [vmem:[%s3096_s1 + $0x10] sm:$0xff]  ;;  %v115_v14 = vld [vmem:[%s3096_s1 + $0x8] sm:$0xff] }
   0x6   :  { %134 = vmatpush.msra.mxu0 %v127_v2  ;;  %1646 = vmatpush.msra.mxu3 %v127_v2  ;;  %v114_v15 = vld [vmem:[%s3096_s1] sm:$0xff]  ;;  %v51_v17 = vld [vmem:[%s3098_s0 + $0x8] sm:$0xff]  ;;  %v52_v18 = vld [vmem:[%s3098_s0 + $0x10] sm:$0xff] }
   0x7   :  { %1645 = vmatpush.msra.mxu1 %v127_v2  ;;  %v50_v16 = vld [vmem:[%s3098_s0] sm:$0xff]  ;;  %v53_v19 = vld [vmem:[%s3098_s0 + $0x18] sm:$0xff]  ;;  %v55_v21 = vld [vmem:[%s3098_s0 + $0x28] sm:$0xff] }
   0x8   :  { %135 = vmatpush.msra.mxu0 %v126_v3  ;;  %1648 = vmatpush.msra.mxu3 %v126_v3  ;;  %v54_v20 = vld [vmem:[%s3098_s0 + $0x20] sm:$0xff]  ;;  %v56_v22 = vld [vmem:[%s3098_s0 + $0x30] sm:$0xff]  ;;  %v57_v23 = vld [vmem:[%s3098_s0 + $0x38] sm:$0xff] }
   0x9   :  { %1647 = vmatpush.msra.mxu1 %v126_v3  ;;  %v58_v24 = vld [vmem:[%s3098_s0 + $0x40] sm:$0xff]  ;;  %v59_v25 = vld [vmem:[%s3098_s0 + $0x48] sm:$0xff]  ;;  %v60_v26 = vld [vmem:[%s3098_s0 + $0x50] sm:$0xff] }
   0xa   :  { %136 = vmatpush.msra.mxu0 %v125_v4  ;;  %1650 = vmatpush.msra.mxu3 %v125_v4  ;;  %v61_v27 = vld [vmem:[%s3098_s0 + $0x58] sm:$0xff]  ;;  %v62_v28 = vld [vmem:[%s3098_s0 + $0x60] sm:$0xff]  ;;  %v63_v29 = vld [vmem:[%s3098_s0 + $0x68] sm:$0xff] }
   0xb   :  { %1649 = vmatpush.msra.mxu1 %v125_v4  ;;  %v64_v30 = vld [vmem:[%s3098_s0 + $0x70] sm:$0xff]  ;;  %v65_v31 = vld [vmem:[%s3098_s0 + $0x78] sm:$0xff]  ;;  %v66_v33 = vld [vmem:[%s3098_s0 + $0x80] sm:$0xff] }
   0xc   :  { %137 = vmatpush.msra.mxu0 %v124_v5  ;;  %1652 = vmatpush.msra.mxu3 %v124_v5  ;;  %v67_v35 = vld [vmem:[%s3098_s0 + $0x88] sm:$0xff]  ;;  %v104_v36 = vld [vmem:[%s3098_s0 + $0x1b0] sm:$0xff]  ;;  %v105_v39 = vld [vmem:[%s3098_s0 + $0x1b8] sm:$0xff] }
   0xd   :  { %1651 = vmatpush.msra.mxu1 %v124_v5  ;;  %v68_v38 = vld [vmem:[%s3098_s0 + $0x90] sm:$0xff]  ;;  %v69_v41 = vld [vmem:[%s3098_s0 + $0x98] sm:$0xff]  ;;  %v106_v42 = vld [vmem:[%s3098_s0 + $0x1c0] sm:$0xff] }
   0xe   :  { %138 = vmatpush.msra.mxu0 %v123_v6  ;;  %1654 = vmatpush.msra.mxu3 %v123_v6  ;;  %v70_v44 = vld [vmem:[%s3098_s0 + $0xa0] sm:$0xff]  ;;  %v107_v45 = vld [vmem:[%s3098_s0 + $0x1c8] sm:$0xff]  ;;  %v108_v48 = vld [vmem:[%s3098_s0 + $0x1d0] sm:$0xff] }
   0xf   :  { %1653 = vmatpush.msra.mxu1 %v123_v6  ;;  %v71_v47 = vld [vmem:[%s3098_s0 + $0xa8] sm:$0xff]  ;;  %v72_v50 = vld [vmem:[%s3098_s0 + $0xb0] sm:$0xff]  ;;  %v109_v51 = vld [vmem:[%s3098_s0 + $0x1d8] sm:$0xff] }
  0x10   :  { %139 = vmatpush.msra.mxu0 %v122_v7  ;;  %1656 = vmatpush.msra.mxu3 %v122_v7  ;;  %v73_v53 = vld [vmem:[%s3098_s0 + $0xb8] sm:$0xff]  ;;  %v110_v54 = vld [vmem:[%s3098_s0 + $0x1e0] sm:$0xff]  ;;  %v111_v57 = vld [vmem:[%s3098_s0 + $0x1e8] sm:$0xff] }
  0x11   :  { %1655 = vmatpush.msra.mxu1 %v122_v7  ;;  %v74_v56 = vld [vmem:[%s3098_s0 + $0xc0] sm:$0xff]  ;;  %v75_v59 = vld [vmem:[%s3098_s0 + $0xc8] sm:$0xff]  ;;  %v112_v60 = vld [vmem:[%s3098_s0 + $0x1f0] sm:$0xff] }
  0x12   :  { %140 = vmatpush.msra.mxu0 %v121_v8  ;;  %1658 = vmatpush.msra.mxu3 %v121_v8  ;;  %v76_v62 = vld [vmem:[%s3098_s0 + $0xd0] sm:$0xff]  ;;  %v113_v63 = vld [vmem:[%s3098_s0 + $0x1f8] sm:$0xff]  ;;  %v78_v4 = vld [vmem:[%s3098_s0 + $0xe0] sm:$0xff] }
  0x13   :  { %1657 = vmatpush.msra.mxu1 %v121_v8  ;;  %v77_v1 = vld [vmem:[%s3098_s0 + $0xd8] sm:$0xff]  ;;  %v98_v5 = vld [vmem:[%s3098_s0 + $0x180] sm:$0xff]  ;;  %v79_v7 = vld [vmem:[%s3098_s0 + $0xe8] sm:$0xff] }
  0x14   :  { %141 = vmatpush.msra.mxu0 %v120_v9  ;;  %1660 = vmatpush.msra.mxu3 %v120_v9  ;;  %v97_v2 = vld [vmem:[%s3098_s0 + $0x178] sm:$0xff]  ;;  %v99_v8 = vld [vmem:[%s3098_s0 + $0x188] sm:$0xff] }
  0x15   :  { %1659 = vmatpush.msra.mxu1 %v120_v9 }
  0x16   :  { %142 = vmatpush.msra.mxu0 %v119_v10  ;;  %1662 = vmatpush.msra.mxu3 %v119_v10 }
  0x17   :  { %1661 = vmatpush.msra.mxu1 %v119_v10  ;;  %v80_v10 = vld [vmem:[%s3098_s0 + $0xf0] sm:$0xff] }
  0x18   :  { %143 = vmatpush.msra.mxu0 %v118_v11  ;;  %1664 = vmatpush.msra.mxu3 %v118_v11 }
  0x19   :  { %1663 = vmatpush.msra.mxu1 %v118_v11  ;;  %v100_v11 = vld [vmem:[%s3098_s0 + $0x190] sm:$0xff] }
  0x1a   :  { %144 = vmatpush.msra.mxu0 %v117_v12  ;;  %1666 = vmatpush.msra.mxu3 %v117_v12 }
  0x1b   :  { %1665 = vmatpush.msra.mxu1 %v117_v12 }
  0x1c   :  { %145 = vmatpush.msra.mxu0 %v116_v13  ;;  %1668 = vmatpush.msra.mxu3 %v116_v13 }
  0x1d   :  { %1667 = vmatpush.msra.mxu1 %v116_v13  ;;  %v81_v13 = vld [vmem:[%s3098_s0 + $0xf8] sm:$0xff] }
  0x1e   :  { %146 = vmatpush.msra.mxu0 %v115_v14  ;;  %1670 = vmatpush.msra.mxu3 %v115_v14 }
  0x1f   :  { %1669 = vmatpush.msra.mxu1 %v115_v14  ;;  %v101_v14 = vld [vmem:[%s3098_s0 + $0x198] sm:$0xff] }
  0x20   :  { %147 = vmatpush.msra.mxu0 %v114_v15  ;;  %1672 = vmatpush.msra.mxu3 %v114_v15 }
  0x21   :  { %148 = vmatmul.f32.vlgmr.msra.gmra.mxu0 %v50_v16  ;;  %1671 = vmatpush.msra.mxu1 %v114_v15  ;;  %v82_v16 = vld [vmem:[%s3098_s0 + $0x100] sm:$0xff] }
  0x22   :  { %310 = vmatmul.f32.vlgmr.msra.gmra.mxu3 %v104_v36  ;;  %289 = vmatmul.f32.vlgmr.msra.gmra.mxu1 %v97_v2  ;;  %v90_v36 = vld [vmem:[%s3098_s0 + $0x140] sm:$0xff]  ;;  %v1513_v2 = vld [vmem:[%s3099_s4 + $0xc8] sm:$0xff] }
  0x29   :  { %151 = vmatmul.f32.gmra.mxu0 %v51_v17  ;;  %v102_v17 = vld [vmem:[%s3098_s0 + $0x1a0] sm:$0xff] }
  0x2a   :  { %313 = vmatmul.f32.gmra.mxu3 %v105_v39  ;;  %292 = vmatmul.f32.gmra.mxu1 %v98_v5  ;;  %v91_v39 = vld [vmem:[%s3098_s0 + $0x148] sm:$0xff]  ;;  %v1512_v5 = vld [vmem:[%s3099_s4 + $0xc0] sm:$0xff] }
  0x31   :  { %154 = vmatmul.f32.gmra.mxu0 %v52_v18 }
  0x32   :  { %316 = vmatmul.f32.gmra.mxu3 %v106_v42  ;;  %295 = vmatmul.f32.gmra.mxu1 %v99_v8  ;;  %v1519_v42 = vld [vmem:[%s3099_s4 + $0xf8] sm:$0xff] }
  0x33   :  { %595 = vmatpush.msra.mxu2 %v1519_v42  ;;  %v1511_v8 = vld [vmem:[%s3099_s4 + $0xb8] sm:$0xff]  ;;  %v489_v42 = vld [vmem:[%s3099_s4] sm:$0xff] }
  0x39   :  { %157 = vmatmul.f32.gmra.mxu0 %v53_v19  ;;  %v83_v19 = vld [vmem:[%s3098_s0 + $0x108] sm:$0xff] }
  0x3a   :  { %319 = vmatmul.f32.gmra.mxu3 %v107_v45  ;;  %298 = vmatmul.f32.gmra.mxu1 %v100_v11  ;;  %v1518_v45 = vld [vmem:[%s3099_s4 + $0xf0] sm:$0xff] }
  0x3b   :  { %596 = vmatpush.msra.mxu2 %v1518_v45  ;;  %v1510_v11 = vld [vmem:[%s3099_s4 + $0xb0] sm:$0xff] }
  0x41   :  { %160 = vmatmul.f32.gmra.mxu0 %v54_v20  ;;  %v103_v20 = vld [vmem:[%s3098_s0 + $0x1a8] sm:$0xff] }
  0x42   :  { %322 = vmatmul.f32.gmra.mxu3 %v108_v48  ;;  %301 = vmatmul.f32.gmra.mxu1 %v101_v14  ;;  %v92_v48 = vld [vmem:[%s3098_s0 + $0x150] sm:$0xff]  ;;  %v94_v14 = vld [vmem:[%s3098_s0 + $0x160] sm:$0xff] }
  0x49   :  { %163 = vmatmul.f32.gmra.mxu0 %v55_v21 }
  0x4a   :  { %325 = vmatmul.f32.gmra.mxu3 %v109_v51  ;;  %304 = vmatmul.f32.gmra.mxu1 %v102_v17  ;;  %v1517_v51 = vld [vmem:[%s3099_s4 + $0xe8] sm:$0xff] }
  0x4b   :  { %597 = vmatpush.msra.mxu2 %v1517_v51  ;;  %v1509_v17 = vld [vmem:[%s3099_s4 + $0xa8] sm:$0xff] }
  0x51   :  { %166 = vmatmul.f32.gmra.mxu0 %v56_v22  ;;  %v84_v22 = vld [vmem:[%s3098_s0 + $0x110] sm:$0xff] }
  0x52   :  { %328 = vmatmul.f32.gmra.mxu3 %v110_v54  ;;  %307 = vmatmul.f32.gmra.mxu1 %v103_v20  ;;  %v1516_v54 = vld [vmem:[%s3099_s4 + $0xe0] sm:$0xff] }
  0x53   :  { %598 = vmatpush.msra.mxu2 %v1516_v54  ;;  %v1508_v20 = vld [vmem:[%s3099_s4 + $0xa0] sm:$0xff] }
  0x54   :  { %v2190_v54 = vld [vmem:[%s3097_s2] ss:$0 sm:$0xff] }
  0x59   :  { %169 = vmatmul.f32.gmra.mxu0 %v57_v23 }
  0x5a   :  { %331 = vmatmul.f32.gmra.mxu3 %v111_v57  ;;  %v1515_v57 = vld [vmem:[%s3099_s4 + $0xd8] sm:$0xff] }
  0x5b   :  { %599 = vmatpush.msra.mxu2 %v1515_v57 }
  0x61   :  { %172 = vmatmul.f32.gmra.mxu0 %v58_v24  ;;  %v85_v24 = vld [vmem:[%s3098_s0 + $0x118] sm:$0xff] }
  0x62   :  { %334 = vmatmul.f32.gmra.mxu3 %v112_v60  ;;  %v1514_v60 = vld [vmem:[%s3099_s4 + $0xd0] sm:$0xff] }
  0x63   :  { %600 = vmatpush.msra.mxu2 %v1514_v60 }
  0x65   :  { %601 = vmatpush.msra.mxu2 %v1513_v2 }
  0x67   :  { %602 = vmatpush.msra.mxu2 %v1512_v5 }
  0x69   :  { %175 = vmatmul.f32.gmra.mxu0 %v59_v25  ;;  %603 = vmatpush.msra.mxu2 %v1511_v8 }
  0x6a   :  { %337 = vmatmul.f32.gmra.mxu3 %v113_v63  ;;  %v93_v63 = vld [vmem:[%s3098_s0 + $0x158] sm:$0xff] }
  0x6b   :  { %604 = vmatpush.msra.mxu2 %v1510_v11 }
  0x6d   :  { %605 = vmatpush.msra.mxu2 %v1509_v17 }
  0x6f   :  { %606 = vmatpush.msra.mxu2 %v1508_v20 }
  0x71   :  { %178 = vmatmul.f32.gmra.mxu0 %v60_v26  ;;  %v86_v26 = vld [vmem:[%s3098_s0 + $0x120] sm:$0xff] }
  0x79   :  { %181 = vmatmul.f32.gmra.mxu0 %v61_v27 }
  0x81   :  { %184 = vmatmul.f32.gmra.mxu0 %v62_v28  ;;  %v87_v28 = vld [vmem:[%s3098_s0 + $0x128] sm:$0xff] }
  0x89   :  { %187 = vmatmul.f32.gmra.mxu0 %v63_v29 }
  0x91   :  { %190 = vmatmul.f32.gmra.mxu0 %v64_v30  ;;  %v88_v30 = vld [vmem:[%s3098_s0 + $0x130] sm:$0xff] }
  0x99   :  { %193 = vmatmul.f32.gmra.mxu0 %v65_v31 }
  0x9e   :  { %v1881_v32 = vpop.f32.mrf.mxu0 }
  0xa1   :  { %196 = vmatmul.f32.gmra.mxu0 %v66_v33  ;;  %v89_v33 = vld [vmem:[%s3098_s0 + $0x138] sm:$0xff] }
  0xa6   :  { %v1886_v34 = vpop.f32.mrf.mxu0 }
  0xa9   :  { %199 = vmatmul.f32.gmra.mxu0 %v67_v35 }
  0xae   :  { %v1894_v37 = vpop.f32.mrf.mxu0 }
  0xb1   :  { %202 = vmatmul.f32.gmra.mxu0 %v68_v38 }
  0xb6   :  { %v1902_v40 = vpop.f32.mrf.mxu0 }
  0xb9   :  { %205 = vmatmul.f32.gmra.mxu0 %v69_v41  ;;  %v504_v41 = vld [vmem:[%s3099_s4 + $0x78] sm:$0xff] }
  0xba   :  { %505 = vmatpush.msrb.mxu1 %v504_v41  ;;  %v1505_v41 = vld [vmem:[%s3099_s4 + $0x88] sm:$0xff] }
  0xbe   :  { %v1910_v43 = vpop.f32.mrf.mxu0 }
  0xc1   :  { %208 = vmatmul.f32.gmra.mxu0 %v70_v44  ;;  %v503_v44 = vld [vmem:[%s3099_s4 + $0x70] sm:$0xff] }
  0xc2   :  { %506 = vmatpush.msrb.mxu1 %v503_v44  ;;  %v1504_v44 = vld [vmem:[%s3099_s4 + $0x80] sm:$0xff] }
  0xc6   :  { %v1918_v46 = vpop.f32.mrf.mxu0 }
  0xc9   :  { %211 = vmatmul.f32.gmra.mxu0 %v71_v47 }
  0xce   :  { %v1926_v49 = vpop.f32.mrf.mxu0 }
  0xd1   :  { %214 = vmatmul.f32.gmra.mxu0 %v72_v50  ;;  %v502_v50 = vld [vmem:[%s3099_s4 + $0x68] sm:$0xff] }
  0xd2   :  { %507 = vmatpush.msrb.mxu1 %v502_v50 }
  0xd6   :  { %v1934_v52 = vpop.f32.mrf.mxu0 }
  0xd9   :  { %217 = vmatmul.f32.gmra.mxu0 %v73_v53  ;;  %v501_v53 = vld [vmem:[%s3099_s4 + $0x60] sm:$0xff] }
  0xda   :  { %508 = vmatpush.msrb.mxu1 %v501_v53 }
  0xde   :  { %v1942_v55 = vpop.f32.mrf.mxu0 }
  0xe1   :  { %220 = vmatmul.f32.gmra.mxu0 %v74_v56  ;;  %v500_v56 = vld [vmem:[%s3099_s4 + $0x58] sm:$0xff] }
  0xe2   :  { %509 = vmatpush.msrb.mxu1 %v500_v56 }
  0xe6   :  { %v1950_v58 = vpop.f32.mrf.mxu0 }
  0xe9   :  { %223 = vmatmul.f32.gmra.mxu0 %v75_v59  ;;  %v499_v59 = vld [vmem:[%s3099_s4 + $0x50] sm:$0xff] }
  0xea   :  { %510 = vmatpush.msrb.mxu1 %v499_v59  ;;  %v150_v59 = vadd.f32 %v2190_v54, %v1881_v32  ;;  %v2206_v32 = vld [vmem:[%s3097_s2 + $0x1] ss:$0 sm:$0xff] }
  0xee   :  { %v1958_v61 = vpop.f32.mrf.mxu0 }
  0xf1   :  { %226 = vmatmul.f32.gmra.mxu0 %v76_v62 }
  0xf6   :  { %v1966_v0 = vpop.f32.mrf.mxu0 }
  0xf9   :  { %229 = vmatmul.f32.gmra.mxu0 %v77_v1  ;;  %v498_v1 = vld [vmem:[%s3099_s4 + $0x48] sm:$0xff] }
  0xfa   :  { %511 = vmatpush.msrb.mxu1 %v498_v1 }
  0xfe   :  { %v1974_v3 = vpop.f32.mrf.mxu0 }
 0x101   :  { %232 = vmatmul.f32.gmra.mxu0 %v78_v4  ;;  %v497_v4 = vld [vmem:[%s3099_s4 + $0x40] sm:$0xff] }
 0x102   :  { %512 = vmatpush.msrb.mxu1 %v497_v4  ;;  %v341_v4 = vmax.f32 %v150_v59, 0.0 }
 0x106   :  { %v1982_v6 = vpop.f32.mrf.mxu0 }
 0x109   :  { %235 = vmatmul.f32.gmra.mxu0 %v79_v7  ;;  %v496_v7 = vld [vmem:[%s3099_s4 + $0x38] sm:$0xff] }
 0x10a   :  { %513 = vmatpush.msrb.mxu1 %v496_v7 }
 0x10e   :  { %v1990_v9 = vpop.f32.mrf.mxu0 }
 0x111   :  { %238 = vmatmul.f32.gmra.mxu0 %v80_v10  ;;  %v495_v10 = vld [vmem:[%s3099_s4 + $0x30] sm:$0xff] }
 0x112   :  { %514 = vmatpush.msrb.mxu1 %v495_v10 }
 0x116   :  { %v1998_v12 = vpop.f32.mrf.mxu0 }
 0x119   :  { %241 = vmatmul.f32.gmra.mxu0 %v81_v13 }
 0x11e   :  { %v2006_v15 = vpop.f32.mrf.mxu0 }
 0x11f   :  { %v198_v56 = vadd.f32 %v2190_v54, %v2006_v15 }
 0x121   :  { %244 = vmatmul.f32.gmra.mxu0 %v82_v16  ;;  %v494_v16 = vld [vmem:[%s3099_s4 + $0x28] sm:$0xff] }
 0x122   :  { %515 = vmatpush.msrb.mxu1 %v494_v16 }
 0x126   :  { %v2014_v18 = vpop.f32.mrf.mxu0 }
 0x127   :  { %v201_v10 = vadd.f32 %v2190_v54, %v2014_v18  ;;  %v2213_v18 = vld [vmem:[%s3097_s2 + $0x2] ss:$0 sm:$0xff] }
 0x129   :  { %247 = vmatmul.f32.gmra.mxu0 %v83_v19  ;;  %v493_v19 = vld [vmem:[%s3099_s4 + $0x20] sm:$0xff] }
 0x12a   :  { %516 = vmatpush.msrb.mxu1 %v493_v19  ;;  %v358_v19 = vmax.f32 %v201_v10, 0.0 }
 0x12e   :  { %v2022_v21 = vpop.f32.mrf.mxu0 }
 0x131   :  { %250 = vmatmul.f32.gmra.mxu0 %v84_v22  ;;  %v492_v22 = vld [vmem:[%s3099_s4 + $0x18] sm:$0xff] }
 0x132   :  { %517 = vmatpush.msrb.mxu1 %v492_v22 }
 0x136   :  { %v2027_v23 = vpop.f32.mrf.mxu0 }
 0x139   :  { %253 = vmatmul.f32.gmra.mxu0 %v85_v24  ;;  %v1507_v24 = vld [vmem:[%s3099_s4 + $0x98] sm:$0xff] }
 0x13a   :  { %607 = vmatpush.msra.mxu2 %v1507_v24 }
 0x13e   :  { %v2032_v25 = vpop.f32.mrf.mxu0 }
 0x141   :  { %256 = vmatmul.f32.gmra.mxu0 %v86_v26  ;;  %v2155_v26 = vpop.f32.mrf.mxu1 }
 0x146   :  { %v2037_v27 = vpop.f32.mrf.mxu0 }
 0x149   :  { %259 = vmatmul.f32.gmra.mxu0 %v87_v28  ;;  %v491_v28 = vld [vmem:[%s3099_s4 + $0x10] sm:$0xff]  ;;  %v293_v50 = vpop.f32.mrf.mxu1 }
 0x14a   :  { %518 = vmatpush.msrb.mxu1 %v491_v28  ;;  %v294_v57 = vadd.f32 %v2190_v54, %v293_v50 }
 0x14c   :  { %v389_v2 = vmax.f32 %v294_v57, 0.0 }
 0x14e   :  { %v2042_v29 = vpop.f32.mrf.mxu0 }
 0x151   :  { %262 = vmatmul.f32.gmra.mxu0 %v88_v30  ;;  %v1506_v30 = vld [vmem:[%s3099_s4 + $0x90] sm:$0xff]  ;;  %v296_v53 = vpop.f32.mrf.mxu1 }
 0x152   :  { %608 = vmatpush.msra.mxu2 %v1506_v30  ;;  %v297_v15 = vadd.f32 %v2190_v54, %v296_v53 }
 0x154   :  { %609 = vmatpush.msra.mxu2 %v1505_v41  ;;  %v390_v24 = vmax.f32 %v297_v15, 0.0 }
 0x156   :  { %v2047_v31 = vpop.f32.mrf.mxu0  ;;  %610 = vmatpush.msra.mxu2 %v1504_v44  ;;  %v156_v44 = vadd.f32 %v2190_v54, %v1894_v37 }
 0x159   :  { %265 = vmatmul.f32.gmra.mxu0 %v89_v33  ;;  %v299_v7 = vpop.f32.mrf.mxu1 }
 0x15e   :  { %v2052_v35 = vpop.f32.mrf.mxu0 }
 0x161   :  { %268 = vmatmul.f32.gmra.mxu0 %v90_v36  ;;  %v95_v36 = vld [vmem:[%s3098_s0 + $0x168] sm:$0xff] }
 0x166   :  { %v2057_v38 = vpop.f32.mrf.mxu0 }
 0x169   :  { %271 = vmatmul.f32.gmra.mxu0 %v91_v39  ;;  %v490_v39 = vld [vmem:[%s3099_s4 + $0x8] sm:$0xff] }
 0x16a   :  { %519 = vmatpush.msrb.mxu1 %v490_v39 }
 0x16c   :  { %520 = vmatpush.msrb.mxu1 %v489_v42  ;;  %v300_v42 = vadd.f32 %v2190_v54, %v299_v7 }
 0x16e   :  { %v2074_v47 = vpop.f32.mrf.mxu0 }
 0x171   :  { %274 = vmatmul.f32.gmra.mxu0 %v92_v48  ;;  %v96_v48 = vld [vmem:[%s3098_s0 + $0x170] sm:$0xff] }
 0x176   :  { %v2103_v62 = vpop.f32.mrf.mxu0 }
 0x179   :  { %277 = vmatmul.f32.gmra.mxu0 %v93_v63  ;;  %v357_v63 = vmax.f32 %v198_v56, 0.0 }
 0x17b   :  { %v405_v8 = vmax.f32 %v341_v4, %v357_v63  ;;  %v311_v63 = vpop.f32.mrf.mxu3 }
 0x17e   :  { %v2132_v13 = vpop.f32.mrf.mxu0 }
 0x181   :  { %280 = vmatmul.f32.gmra.mxu0 %v94_v14  ;;  %v153_v14 = vadd.f32 %v2190_v54, %v1886_v34 }
 0x183   :  { %v342_v28 = vmax.f32 %v153_v14, 0.0 }
 0x185   :  { %v406_v39 = vmax.f32 %v342_v28, %v358_v19  ;;  %v314_v28 = vpop.f32.mrf.mxu3 }
 0x186   :  { %v2163_v33 = vpop.f32.mrf.mxu0 }
 0x189   :  { %283 = vmatmul.f32.gmra.mxu0 %v95_v36  ;;  %v204_v36 = vadd.f32 %v2190_v54, %v2022_v21  ;;  %v391_v21 = vmax.f32 %v300_v42, 0.0 }
 0x18b   :  { %v359_v53 = vmax.f32 %v204_v36, 0.0 }
 0x18e   :  { %v2180_v45 = vpop.f32.mrf.mxu0 }
 0x191   :  { %286 = vmatmul.f32.gmra.mxu0 %v96_v48  ;;  %v302_v48 = vpop.f32.mrf.mxu1 }
 0x192   :  { %v303_v7 = vadd.f32 %v2190_v54, %v302_v48 }
 0x194   :  { %v392_v19 = vmax.f32 %v303_v7, 0.0 }
 0x196   :  { %v2185_v51 = vpop.f32.mrf.mxu0 }
 0x199   :  { %v305_v15 = vpop.f32.mrf.mxu1 }
 0x19a   :  { %v306_v36 = vadd.f32 %v2190_v54, %v305_v15 }
 0x19e   :  { %v245_v60 = vpop.f32.mrf.mxu0 }
 0x19f   :  { %v246_v1 = vadd.f32 %v2190_v54, %v245_v60  ;;  %v343_v60 = vmax.f32 %v156_v44, 0.0 }
 0x1a1   :  { %v373_v5 = vmax.f32 %v246_v1, 0.0  ;;  %v407_v4 = vmax.f32 %v343_v60, %v359_v53  ;;  %v213_v60 = vadd.f32 %v2190_v54, %v2037_v27 }
 0x1a3   :  { %v421_v11 = vmax.f32 %v373_v5, %v389_v2  ;;  %v207_v5 = vadd.f32 %v2190_v54, %v2027_v23 }
 0x1a5   :  { %v437_v16 = vmax.f32 %v405_v8, %v421_v11  ;;  %v159_v8 = vadd.f32 %v2190_v54, %v1902_v40  ;;  %v360_v14 = vmax.f32 %v207_v5, 0.0  ;;  %v165_v5 = vadd.f32 %v2190_v54, %v1918_v46 }
 0x1a6   :  { %v248_v17 = vpop.f32.mrf.mxu0 }
 0x1a7   :  { %v455_v20 = vmul.f32 %v2206_v32, %v437_v16  ;;  %v249_v22 = vadd.f32 %v2190_v54, %v248_v17  ;;  %v344_v23 = vmax.f32 %v159_v8, 0.0  ;;  %v362_v8 = vmax.f32 %v213_v60, 0.0 }
 0x1a8   :  { %v346_v27 = vmax.f32 %v165_v5, 0.0 }
 0x1a9   :  { %v374_v34 = vmax.f32 %v249_v22, 0.0  ;;  %v2216_v30 = vadd.f32 %v2213_v18, %v455_v20 }
 0x1ab   :  { %v422_v41 = vmax.f32 %v374_v34, %v390_v24  ;;  %521 = vmatmul.f32.vlgmr.msrb.gmra.mxu1 %v2216_v30  ;;  %611 = vmatmul.f32.vlgmr.msra.gmra.mxu2 %v2216_v30  ;;  %v210_v24 = vadd.f32 %v2190_v54, %v2032_v25  ;;  %v408_v34 = vmax.f32 %v344_v23, %v360_v14  ;;  %v393_v25 = vmax.f32 %v306_v36, 0.0 }
 0x1ac   :  { %v216_v23 = vadd.f32 %v2190_v54, %v2042_v29 }
 0x1ad   :  { %v438_v50 = vmax.f32 %v406_v39, %v422_v41  ;;  %v162_v39 = vadd.f32 %v2190_v54, %v1910_v43  ;;  %v361_v42 = vmax.f32 %v210_v24, 0.0 }
 0x1ae   :  { %v251_v56 = vpop.f32.mrf.mxu0  ;;  %v363_v36 = vmax.f32 %v216_v23, 0.0 }
 0x1af   :  { %v456_v57 = vmul.f32 %v2206_v32, %v438_v50  ;;  %v252_v59 = vadd.f32 %v2190_v54, %v251_v56  ;;  %v345_v53 = vmax.f32 %v162_v39, 0.0  ;;  %v308_v56 = vpop.f32.mrf.mxu1 }
 0x1b0   :  { %v309_v43 = vadd.f32 %v2190_v54, %v308_v56 }
 0x1b1   :  { %v375_v1 = vmax.f32 %v252_v59, 0.0  ;;  %v2228_v2 = vadd.f32 %v2213_v18, %v456_v57 }
 0x1b2   :  { %v394_v15 = vmax.f32 %v309_v43, 0.0 }
 0x1b3   :  { %v423_v37 = vmax.f32 %v375_v1, %v391_v21  ;;  %524 = vmatmul.f32.gmra.mxu1 %v2228_v2  ;;  %614 = vmatmul.f32.gmra.mxu2 %v2228_v2  ;;  %v409_v21 = vmax.f32 %v345_v53, %v361_v42  ;;  %v171_v53 = vadd.f32 %v2190_v54, %v1934_v52 }
 0x1b4   :  { %v222_v52 = vadd.f32 %v2190_v54, %v2052_v35 }
 0x1b5   :  { %v439_v10 = vmax.f32 %v407_v4, %v423_v37  ;;  %v317_v4 = vpop.f32.mrf.mxu3  ;;  %v348_v5 = vmax.f32 %v171_v53, 0.0 }
 0x1b6   :  { %v254_v11 = vpop.f32.mrf.mxu0 }
 0x1b7   :  { %v457_v16 = vmul.f32 %v2206_v32, %v439_v10  ;;  %v255_v17 = vadd.f32 %v2190_v54, %v254_v11 }
 0x1b9   :  { %v376_v20 = vmax.f32 %v255_v17, 0.0  ;;  %v2240_v22 = vadd.f32 %v2213_v18, %v457_v16  ;;  %v312_v17 = vadd.f32 %v2190_v54, %v311_v63 }
 0x1bb   :  { %v424_v40 = vmax.f32 %v376_v20, %v392_v19  ;;  %527 = vmatmul.f32.gmra.mxu1 %v2240_v22  ;;  %617 = vmatmul.f32.gmra.mxu2 %v2240_v22  ;;  %v410_v19 = vmax.f32 %v346_v27, %v362_v8  ;;  %v168_v20 = vadd.f32 %v2190_v54, %v1926_v49  ;;  %v395_v39 = vmax.f32 %v312_v17, 0.0 }
 0x1bc   :  { %v219_v49 = vadd.f32 %v2190_v54, %v2047_v31 }
 0x1bd   :  { %v440_v41 = vmax.f32 %v408_v34, %v424_v40  ;;  %v320_v34 = vpop.f32.mrf.mxu3  ;;  %v347_v42 = vmax.f32 %v168_v20, 0.0 }
 0x1be   :  { %v257_v44 = vpop.f32.mrf.mxu0  ;;  %v321_v20 = vadd.f32 %v2190_v54, %v320_v34 }
 0x1bf   :  { %v458_v48 = vmul.f32 %v2206_v32, %v440_v41  ;;  %v258_v50 = vadd.f32 %v2190_v54, %v257_v44 }
 0x1c1   :  { %v377_v57 = vmax.f32 %v258_v50, 0.0  ;;  %v2252_v59 = vadd.f32 %v2213_v18, %v458_v48  ;;  %v315_v48 = vadd.f32 %v2190_v54, %v314_v28  ;;  %v411_v50 = vmax.f32 %v347_v42, %v363_v36 }
 0x1c3   :  { %v425_v1 = vmax.f32 %v377_v57, %v393_v25  ;;  %530 = vmatmul.f32.gmra.mxu1 %v2252_v59  ;;  %620 = vmatmul.f32.gmra.mxu2 %v2252_v59  ;;  %v396_v60 = vmax.f32 %v315_v48, 0.0 }
 0x1c5   :  { %v441_v37 = vmax.f32 %v409_v21, %v425_v1  ;;  %v364_v21 = vmax.f32 %v219_v49, 0.0  ;;  %v323_v43 = vpop.f32.mrf.mxu3 }
 0x1c6   :  { %v260_v7 = vpop.f32.mrf.mxu0 }
 0x1c7   :  { %v459_v10 = vmul.f32 %v2206_v32, %v441_v37  ;;  %v261_v11 = vadd.f32 %v2190_v54, %v260_v7  ;;  %v318_v7 = vadd.f32 %v2190_v54, %v317_v4  ;;  %v412_v8 = vmax.f32 %v348_v5, %v364_v21 }
 0x1c9   :  { %v378_v14 = vmax.f32 %v261_v11, 0.0  ;;  %v2264_v16 = vadd.f32 %v2213_v18, %v459_v10  ;;  %v174_v11 = vadd.f32 %v2190_v54, %v1942_v55  ;;  %v397_v17 = vmax.f32 %v318_v7, 0.0 }
 0x1ca   :  { %v225_v55 = vadd.f32 %v2190_v54, %v2057_v38 }
 0x1cb   :  { %v426_v46 = vmax.f32 %v378_v14, %v394_v15  ;;  %533 = vmatmul.f32.gmra.mxu1 %v2264_v16  ;;  %623 = vmatmul.f32.gmra.mxu2 %v2264_v16  ;;  %v365_v14 = vmax.f32 %v222_v52, 0.0  ;;  %v349_v23 = vmax.f32 %v174_v11, 0.0  ;;  %v1540_v11 = vld [vmem:[%s3099_s4 + $0x160] sm:$0xff] }
 0x1cc   :  { %v366_v42 = vmax.f32 %v225_v55, 0.0 }
 0x1cd   :  { %v442_v24 = vmax.f32 %v410_v19, %v426_v46 }
 0x1ce   :  { %v263_v40 = vpop.f32.mrf.mxu0 }
 0x1cf   :  { %v460_v41 = vmul.f32 %v2206_v32, %v442_v24  ;;  %v264_v63 = vadd.f32 %v2190_v54, %v263_v40  ;;  %v326_v24 = vpop.f32.mrf.mxu3  ;;  %v413_v40 = vmax.f32 %v349_v23, %v365_v14  ;;  %v231_v14 = vadd.f32 %v2190_v54, %v2103_v62 }
 0x1d1   :  { %v379_v44 = vmax.f32 %v264_v63, 0.0  ;;  %v2276_v29 = vadd.f32 %v2213_v18, %v460_v41 }
 0x1d3   :  { %v427_v25 = vmax.f32 %v379_v44, %v395_v39  ;;  %536 = vmatmul.f32.gmra.mxu1 %v2276_v29  ;;  %626 = vmatmul.f32.gmra.mxu2 %v2276_v29  ;;  %v177_v39 = vadd.f32 %v2190_v54, %v1950_v58  ;;  %v398_v44 = vmax.f32 %v321_v20, 0.0 }
 0x1d5   :  { %v443_v56 = vmax.f32 %v411_v50, %v427_v25  ;;  %v350_v50 = vmax.f32 %v177_v39, 0.0  ;;  %v324_v25 = vadd.f32 %v2190_v54, %v323_v43  ;;  %v1537_v39 = vld [vmem:[%s3099_s4 + $0x148] sm:$0xff] }
 0x1d6   :  { %v266_v57 = vpop.f32.mrf.mxu0 }
 0x1d7   :  { %v461_v1 = vmul.f32 %v2206_v32, %v443_v56  ;;  %v267_v28 = vadd.f32 %v2190_v54, %v266_v57  ;;  %v414_v53 = vmax.f32 %v350_v50, %v366_v42  ;;  %v228_v56 = vadd.f32 %v2190_v54, %v2074_v47  ;;  %v1543_v57 = vld [vmem:[%s3099_s4 + $0x178] sm:$0xff]  ;;  %v329_v21 = vpop.f32.mrf.mxu3 }
 0x1d8   :  { %768 = vmatpush.msra.mxu1 %v1543_v57  ;;  %v399_v5 = vmax.f32 %v324_v25, 0.0  ;;  %v1534_v25 = vld [vmem:[%s3099_s4 + $0x130] sm:$0xff] }
 0x1d9   :  { %v380_v37 = vmax.f32 %v267_v28, 0.0  ;;  %v2288_v31 = vadd.f32 %v2213_v18, %v461_v1  ;;  %v1542_v28 = vld [vmem:[%s3099_s4 + $0x170] sm:$0xff]  ;;  %v367_v43 = vmax.f32 %v228_v56, 0.0 }
 0x1da   :  { %769 = vmatpush.msra.mxu1 %v1542_v28  ;;  %v1532_v28 = vld [vmem:[%s3099_s4 + $0x120] sm:$0xff] }
 0x1db   :  { %v428_v10 = vmax.f32 %v380_v37, %v396_v60  ;;  %539 = vmatmul.f32.gmra.mxu1 %v2288_v31  ;;  %629 = vmatmul.f32.gmra.mxu2 %v2288_v31  ;;  %v180_v60 = vadd.f32 %v2190_v54, %v1958_v61 }
 0x1dd   :  { %v444_v15 = vmax.f32 %v412_v8, %v428_v10  ;;  %v1541_v8 = vld [vmem:[%s3099_s4 + $0x168] sm:$0xff]  ;;  %v351_v52 = vmax.f32 %v180_v60, 0.0 }
 0x1de   :  { %v269_v27 = vpop.f32.mrf.mxu0  ;;  %770 = vmatpush.msra.mxu1 %v1541_v8  ;;  %v237_v8 = vadd.f32 %v2190_v54, %v2163_v33 }
 0x1df   :  { %v462_v19 = vmul.f32 %v2206_v32, %v444_v15  ;;  %v270_v4 = vadd.f32 %v2190_v54, %v269_v27  ;;  %v327_v15 = vadd.f32 %v2190_v54, %v326_v24  ;;  %v415_v27 = vmax.f32 %v351_v52, %v367_v43  ;;  %v332_v20 = vpop.f32.mrf.mxu3 }
 0x1e0   :  { %771 = vmatpush.msra.mxu1 %v1540_v11  ;;  %v368_v24 = vmax.f32 %v231_v14, 0.0  ;;  %v1530_v11 = vld [vmem:[%s3099_s4 + $0x110] sm:$0xff]  ;;  %v370_v33 = vmax.f32 %v237_v8, 0.0 }
 0x1e1   :  { %v381_v46 = vmax.f32 %v270_v4, 0.0  ;;  %v2300_v35 = vadd.f32 %v2213_v18, %v462_v19  ;;  %v1539_v19 = vld [vmem:[%s3099_s4 + $0x158] sm:$0xff]  ;;  %v183_v4 = vadd.f32 %v2190_v54, %v1966_v0  ;;  %v1536_v0 = vld [vmem:[%s3099_s4 + $0x140] sm:$0xff] }
 0x1e2   :  { %772 = vmatpush.msra.mxu1 %v1539_v19 }
 0x1e3   :  { %v429_v36 = vmax.f32 %v381_v46, %v397_v17  ;;  %542 = vmatmul.f32.gmra.mxu1 %v2300_v35  ;;  %632 = vmatmul.f32.gmra.mxu2 %v2300_v35  ;;  %v1538_v46 = vld [vmem:[%s3099_s4 + $0x150] sm:$0xff] }
 0x1e4   :  { %773 = vmatpush.msra.mxu1 %v1538_v46  ;;  %v1528_v46 = vld [vmem:[%s3099_s4 + $0x100] sm:$0xff] }
 0x1e5   :  { %v445_v41 = vmax.f32 %v413_v40, %v429_v36  ;;  %v400_v40 = vmax.f32 %v327_v15, 0.0  ;;  %v189_v15 = vadd.f32 %v2190_v54, %v1982_v6 }
 0x1e6   :  { %v272_v63 = vpop.f32.mrf.mxu0  ;;  %774 = vmatpush.msra.mxu1 %v1537_v39 }
 0x1e7   :  { %v463_v48 = vmul.f32 %v2206_v32, %v445_v41  ;;  %v273_v34 = vadd.f32 %v2190_v54, %v272_v63  ;;  %v352_v41 = vmax.f32 %v183_v4, 0.0 }
 0x1e8   :  { %775 = vmatpush.msra.mxu1 %v1536_v0  ;;  %v192_v0 = vadd.f32 %v2190_v54, %v1990_v9 }
 0x1e9   :  { %v382_v49 = vmax.f32 %v273_v34, 0.0  ;;  %v2312_v38 = vadd.f32 %v2213_v18, %v463_v48  ;;  %v416_v48 = vmax.f32 %v352_v41, %v368_v24  ;;  %v234_v34 = vadd.f32 %v2190_v54, %v2132_v13  ;;  %v1533_v13 = vld [vmem:[%s3099_s4 + $0x128] sm:$0xff] }
 0x1ea   :  { %v291_v41 = vadd.f32 %v2190_v54, %v2155_v26  ;;  %v355_v9 = vmax.f32 %v192_v0, 0.0 }
 0x1eb   :  { %v430_v58 = vmax.f32 %v382_v49, %v398_v44  ;;  %545 = vmatmul.f32.gmra.mxu1 %v2312_v38  ;;  %635 = vmatmul.f32.gmra.mxu2 %v2312_v38  ;;  %v330_v44 = vadd.f32 %v2190_v54, %v329_v21  ;;  %v1535_v49 = vld [vmem:[%s3099_s4 + $0x138] sm:$0xff]  ;;  %v369_v57 = vmax.f32 %v234_v34, 0.0 }
 0x1ec   :  { %776 = vmatpush.msra.mxu1 %v1535_v49 }
 0x1ed   :  { %v446_v1 = vmax.f32 %v414_v53, %v430_v58  ;;  %v186_v53 = vadd.f32 %v2190_v54, %v1974_v3  ;;  %v401_v21 = vmax.f32 %v330_v44, 0.0 }
 0x1ee   :  { %v275_v47 = vpop.f32.mrf.mxu0  ;;  %777 = vmatpush.msra.mxu1 %v1534_v25 }
 0x1ef   :  { %v464_v37 = vmul.f32 %v2206_v32, %v446_v1  ;;  %v276_v7 = vadd.f32 %v2190_v54, %v275_v47  ;;  %v335_v47 = vpop.f32.mrf.mxu3  ;;  %v353_v3 = vmax.f32 %v186_v53, 0.0 }
 0x1f0   :  { %778 = vmatpush.msra.mxu1 %v1533_v13  ;;  %v336_v24 = vadd.f32 %v2190_v54, %v335_v47 }
 0x1f1   :  { %v383_v61 = vmax.f32 %v276_v7, 0.0  ;;  %v2333_v10 = vadd.f32 %v2213_v18, %v464_v37  ;;  %v333_v37 = vadd.f32 %v2190_v54, %v332_v20  ;;  %v417_v7 = vmax.f32 %v353_v3, %v369_v57 }
 0x1f2   :  { %779 = vmatpush.msra.mxu1 %v1532_v28  ;;  %v354_v20 = vmax.f32 %v189_v15, 0.0  ;;  %v403_v49 = vmax.f32 %v336_v24, 0.0 }
 0x1f3   :  { %v431_v17 = vmax.f32 %v383_v61, %v399_v5  ;;  %548 = vmatmul.f32.gmra.mxu1 %v2333_v10  ;;  %638 = vmatmul.f32.gmra.mxu2 %v2333_v10  ;;  %v1531_v61 = vld [vmem:[%s3099_s4 + $0x118] sm:$0xff] }
 0x1f4   :  { %780 = vmatpush.msra.mxu1 %v1531_v61 }
 0x1f5   :  { %v447_v23 = vmax.f32 %v415_v27, %v431_v17  ;;  %v402_v17 = vmax.f32 %v333_v37, 0.0 }
 0x1f6   :  { %v278_v62 = vpop.f32.mrf.mxu0  ;;  %781 = vmatpush.msra.mxu1 %v1530_v11 }
 0x1f7   :  { %v465_v55 = vmul.f32 %v2206_v32, %v447_v23  ;;  %v279_v36 = vadd.f32 %v2190_v54, %v278_v62  ;;  %v1529_v23 = vld [vmem:[%s3099_s4 + $0x108] sm:$0xff] }
 0x1f8   :  { %782 = vmatpush.msra.mxu1 %v1529_v23 }
 0x1f9   :  { %v384_v63 = vmax.f32 %v279_v36, 0.0  ;;  %v2360_v42 = vadd.f32 %v2213_v18, %v465_v55  ;;  %v418_v55 = vmax.f32 %v354_v20, %v370_v33  ;;  %v240_v36 = vadd.f32 %v2190_v54, %v2180_v45 }
 0x1fa   :  { %783 = vmatpush.msra.mxu1 %v1528_v46  ;;  %v195_v45 = vadd.f32 %v2190_v54, %v1998_v12 }
 0x1fb   :  { %v432_v50 = vmax.f32 %v384_v63, %v400_v40  ;;  %551 = vmatmul.f32.gmra.mxu1 %v2360_v42  ;;  %641 = vmatmul.f32.gmra.mxu2 %v2360_v42  ;;  %v338_v40 = vpop.f32.mrf.mxu3  ;;  %v243_v63 = vadd.f32 %v2190_v54, %v2185_v51 }
 0x1fc   :  { %v339_v44 = vadd.f32 %v2190_v54, %v338_v40  ;;  %v356_v57 = vmax.f32 %v195_v45, 0.0 }
 0x1fd   :  { %v448_v56 = vmax.f32 %v416_v48, %v432_v50  ;;  %v371_v50 = vmax.f32 %v240_v36, 0.0  ;;  %v372_v13 = vmax.f32 %v243_v63, 0.0 }
 0x1fe   :  { %v281_v58 = vpop.f32.mrf.mxu0  ;;  %v404_v26 = vmax.f32 %v339_v44, 0.0 }
 0x1ff   :  { %v466_v60 = vmul.f32 %v2206_v32, %v448_v56  ;;  %v282_v1 = vadd.f32 %v2190_v54, %v281_v58  ;;  %v388_v56 = vmax.f32 %v291_v41, 0.0  ;;  %v420_v12 = vmax.f32 %v356_v57, %v372_v13  ;;  %v1524_v13 = vld [vmem:[%s3100_s3 + $0x60] sm:$0xff]  ;;  %v1525_v57 = vld [vmem:[%s3100_s3 + $0x68] sm:$0xff] }
 0x201   :  { %v385_v43 = vmax.f32 %v282_v1, 0.0  ;;  %v2384_v5 = vadd.f32 %v2213_v18, %v466_v60  ;;  %v436_v1 = vmax.f32 %v388_v56, %v404_v26  ;;  %v1520_v26 = vld [vmem:[%s3100_s3 + $0x40] sm:$0xff] }
 0x203   :  { %v433_v52 = vmax.f32 %v385_v43, %v401_v21  ;;  %554 = vmatmul.f32.gmra.mxu1 %v2384_v5  ;;  %644 = vmatmul.f32.gmra.mxu2 %v2384_v5  ;;  %v419_v21 = vmax.f32 %v355_v9, %v371_v50  ;;  %v452_v47 = vmax.f32 %v420_v12, %v436_v1  ;;  %v1526_v12 = vld [vmem:[%s3100_s3 + $0x70] sm:$0xff] }
 0x204   :  { %v1522_v1 = vld [vmem:[%s3100_s3 + $0x50] sm:$0xff] }
 0x205   :  { %v449_v27 = vmax.f32 %v417_v7, %v433_v52  ;;  %v470_v43 = vmul.f32 %v2206_v32, %v452_v47  ;;  %v1523_v47 = vld [vmem:[%s3100_s3 + $0x58] sm:$0xff] }
 0x206   :  { %v284_v14 = vpop.f32.mrf.mxu0 }
 0x207   :  { %v467_v19 = vmul.f32 %v2206_v32, %v449_v27  ;;  %v285_v4 = vadd.f32 %v2190_v54, %v284_v14  ;;  %v2439_v37 = vadd.f32 %v2213_v18, %v470_v43 }
 0x209   :  { %v386_v6 = vmax.f32 %v285_v4, 0.0  ;;  %v2408_v62 = vadd.f32 %v2213_v18, %v467_v19 }
 0x20b   :  { %v434_v39 = vmax.f32 %v386_v6, %v402_v17  ;;  %557 = vmatmul.f32.gmra.mxu1 %v2408_v62  ;;  %647 = vmatmul.f32.gmra.mxu2 %v2408_v62 }
 0x20d   :  { %v450_v48 = vmax.f32 %v418_v55, %v434_v39 }
 0x20e   :  { %v287_v34 = vpop.f32.mrf.mxu0 }
 0x20f   :  { %v468_v25 = vmul.f32 %v2206_v32, %v450_v48  ;;  %v288_v53 = vadd.f32 %v2190_v54, %v287_v34 }
 0x211   :  { %v387_v58 = vmax.f32 %v288_v53, 0.0  ;;  %v2427_v51 = vadd.f32 %v2213_v18, %v468_v25 }
 0x213   :  { %v435_v60 = vmax.f32 %v387_v58, %v403_v49  ;;  %560 = vmatmul.f32.gmra.mxu1 %v2427_v51  ;;  %650 = vmatmul.f32.gmra.mxu2 %v2427_v51 }
 0x215   :  { %v451_v28 = vmax.f32 %v419_v21, %v435_v60  ;;  %v1521_v21 = vld [vmem:[%s3100_s3 + $0x48] sm:$0xff] }
 0x217   :  { %v469_v54 = vmul.f32 %v2206_v32, %v451_v28 }
 0x219   :  { %v2433_v3 = vadd.f32 %v2213_v18, %v469_v54  ;;  %v1527_v54 = vld [vmem:[%s3100_s3 + $0x78] sm:$0xff] }
 0x21b   :  { %563 = vmatmul.f32.gmra.mxu1 %v2433_v3  ;;  %653 = vmatmul.f32.gmra.mxu2 %v2433_v3 }
 0x223   :  { %566 = vmatmul.f32.gmra.mxu1 %v2439_v37  ;;  %656 = vmatmul.f32.gmra.mxu2 %v2439_v37 }
 0x228   :  { %v2443_v7 = vpop.f32.mrf.mxu1 }
 0x22b   :  { %784 = vmatmul.f32.vlgmr.msra.gmra.mxu1 %v2216_v30 }
 0x22e   :  { %v2446_v8 = vpop.f32.mrf.mxu2 }
 0x230   :  { %v2448_v52 = vpop.f32.mrf.mxu1 }
 0x233   :  { %787 = vmatmul.f32.gmra.mxu1 %v2228_v2 }
 0x236   :  { %v2451_v61 = vpop.f32.mrf.mxu2 }
 0x238   :  { %v2453_v32 = vpop.f32.mrf.mxu1 }
 0x23b   :  { %790 = vmatmul.f32.gmra.mxu1 %v2240_v22 }
 0x23e   :  { %v2456_v18 = vpop.f32.mrf.mxu2 }
 0x240   :  { %v2458_v11 = vpop.f32.mrf.mxu1 }
 0x243   :  { %793 = vmatmul.f32.gmra.mxu1 %v2252_v59 }
 0x246   :  { %v2461_v15 = vpop.f32.mrf.mxu2 }
 0x248   :  { %v2463_v27 = vpop.f32.mrf.mxu1 }
 0x24b   :  { %796 = vmatmul.f32.gmra.mxu1 %v2264_v16 }
 0x24e   :  { %v624_v14 = vpop.f32.mrf.mxu2 }
 0x250   :  { %v2466_v33 = vpop.f32.mrf.mxu1 }
 0x253   :  { %799 = vmatmul.f32.gmra.mxu1 %v2276_v29 }
 0x256   :  { %v627_v17 = vpop.f32.mrf.mxu2 }
 0x258   :  { %v2469_v19 = vpop.f32.mrf.mxu1 }
 0x25b   :  { %802 = vmatmul.f32.gmra.mxu1 %v2288_v31 }
 0x25e   :  { %v630_v4 = vpop.f32.mrf.mxu2 }
 0x260   :  { %v2472_v23 = vpop.f32.mrf.mxu1 }
 0x263   :  { %805 = vmatmul.f32.gmra.mxu1 %v2300_v35 }
 0x266   :  { %v633_v46 = vpop.f32.mrf.mxu2 }
 0x268   :  { %v2475_v20 = vpop.f32.mrf.mxu1 }
 0x26b   :  { %808 = vmatmul.f32.gmra.mxu1 %v2312_v38 }
 0x26e   :  { %v636_v6 = vpop.f32.mrf.mxu2 }
 0x270   :  { %v2478_v24 = vpop.f32.mrf.mxu1 }
 0x273   :  { %811 = vmatmul.f32.gmra.mxu1 %v2333_v10 }
 0x276   :  { %v639_v40 = vpop.f32.mrf.mxu2 }
 0x278   :  { %v2481_v55 = vpop.f32.mrf.mxu1 }
 0x27b   :  { %814 = vmatmul.f32.gmra.mxu1 %v2360_v42 }
 0x27e   :  { %v642_v36 = vpop.f32.mrf.mxu2 }
 0x280   :  { %v2484_v39 = vpop.f32.mrf.mxu1 }
 0x283   :  { %817 = vmatmul.f32.gmra.mxu1 %v2384_v5 }
 0x286   :  { %v645_v0 = vpop.f32.mrf.mxu2 }
 0x288   :  { %v558_v41 = vpop.f32.mrf.mxu1 }
 0x28b   :  { %820 = vmatmul.f32.gmra.mxu1 %v2408_v62 }
 0x28e   :  { %v648_v63 = vpop.f32.mrf.mxu2 }
 0x290   :  { %v561_v44 = vpop.f32.mrf.mxu1 }
 0x293   :  { %823 = vmatmul.f32.gmra.mxu1 %v2427_v51 }
 0x296   :  { %v651_v48 = vpop.f32.mrf.mxu2 }
 0x298   :  { %v564_v45 = vpop.f32.mrf.mxu1 }
 0x29b   :  { %826 = vmatmul.f32.gmra.mxu1 %v2433_v3 }
 0x29e   :  { %v654_v34 = vpop.f32.mrf.mxu2 }
 0x2a0   :  { %v567_v50 = vpop.f32.mrf.mxu1 }
 0x2a3   :  { %829 = vmatmul.f32.gmra.mxu1 %v2439_v37 }
 0x2a6   :  { %v657_v49 = vpop.f32.mrf.mxu2 }
 0x2a7   :  { %669 = vmatpush.msrb.mxu2 %v657_v49  ;;  %1673 = vmatpush.msrb.mxu3 %v657_v49 }
 0x2a8   :  { %v2491_v25 = vpop.f32.mrf.mxu1 }
 0x2a9   :  { %670 = vmatpush.msrb.mxu2 %v654_v34  ;;  %1674 = vmatpush.msrb.mxu3 %v654_v34 }
 0x2ab   :  { %671 = vmatpush.msrb.mxu2 %v651_v48  ;;  %1675 = vmatpush.msrb.mxu3 %v651_v48 }
 0x2ad   :  { %672 = vmatpush.msrb.mxu2 %v648_v63  ;;  %1676 = vmatpush.msrb.mxu3 %v648_v63 }
 0x2af   :  { %673 = vmatpush.msrb.mxu2 %v645_v0  ;;  %1677 = vmatpush.msrb.mxu3 %v645_v0  ;;  %v1553_v0 = vld [vmem:[%s3099_s4 + $0x188] sm:$0xff] }
 0x2b0   :  { %v2493_v53 = vpop.f32.mrf.mxu1 }
 0x2b1   :  { %674 = vmatpush.msrb.mxu2 %v642_v36  ;;  %1678 = vmatpush.msrb.mxu3 %v642_v36  ;;  %v1554_v36 = vld [vmem:[%s3099_s4 + $0x190] sm:$0xff] }
 0x2b3   :  { %675 = vmatpush.msrb.mxu2 %v639_v40  ;;  %1679 = vmatpush.msrb.mxu3 %v639_v40  ;;  %v1555_v40 = vld [vmem:[%s3099_s4 + $0x198] sm:$0xff] }
 0x2b5   :  { %676 = vmatpush.msrb.mxu2 %v636_v6  ;;  %1680 = vmatpush.msrb.mxu3 %v636_v6  ;;  %v1556_v6 = vld [vmem:[%s3099_s4 + $0x1a0] sm:$0xff] }
 0x2b7   :  { %677 = vmatpush.msrb.mxu2 %v633_v46  ;;  %1681 = vmatpush.msrb.mxu3 %v633_v46  ;;  %v1558_v46 = vld [vmem:[%s3099_s4 + $0x1b0] sm:$0xff] }
 0x2b8   :  { %v2495_v9 = vpop.f32.mrf.mxu1 }
 0x2b9   :  { %678 = vmatpush.msrb.mxu2 %v630_v4  ;;  %1682 = vmatpush.msrb.mxu3 %v630_v4  ;;  %v1559_v4 = vld [vmem:[%s3099_s4 + $0x1b8] sm:$0xff] }
 0x2bb   :  { %679 = vmatpush.msrb.mxu2 %v627_v17  ;;  %1683 = vmatpush.msrb.mxu3 %v627_v17  ;;  %v1560_v17 = vld [vmem:[%s3099_s4 + $0x1c0] sm:$0xff] }
 0x2bd   :  { %680 = vmatpush.msrb.mxu2 %v624_v14  ;;  %1684 = vmatpush.msrb.mxu3 %v624_v14  ;;  %v1562_v14 = vld [vmem:[%s3099_s4 + $0x1d0] sm:$0xff] }
 0x2bf   :  { %681 = vmatpush.msrb.mxu2 %v2461_v15  ;;  %1685 = vmatpush.msrb.mxu3 %v2461_v15  ;;  %v1563_v15 = vld [vmem:[%s3099_s4 + $0x1d8] sm:$0xff] }
 0x2c0   :  { %v2499_v56 = vpop.f32.mrf.mxu1 }
 0x2c1   :  { %682 = vmatpush.msrb.mxu2 %v2456_v18  ;;  %1686 = vmatpush.msrb.mxu3 %v2456_v18 }
 0x2c3   :  { %683 = vmatpush.msrb.mxu2 %v2451_v61  ;;  %1687 = vmatpush.msrb.mxu3 %v2451_v61  ;;  %v1567_v61 = vld [vmem:[%s3099_s4 + $0x1f8] sm:$0xff] }
 0x2c5   :  { %684 = vmatpush.msrb.mxu2 %v2446_v8  ;;  %1688 = vmatpush.msrb.mxu3 %v2446_v8  ;;  %v570_v8 = vld [vmem:[%s3100_s3] sm:$0xff] }
 0x2c6   :  { %697 = vmatmul.f32.vlgmr.msrb.gmra.mxu3 %v1524_v13  ;;  %685 = vmatmul.f32.vlgmr.msrb.gmra.mxu2 %v1520_v26  ;;  %v1550_v13 = vld [vmem:[%s3100_s3 + $0xb0] sm:$0xff]  ;;  %v1551_v26 = vld [vmem:[%s3100_s3 + $0xb8] sm:$0xff] }
 0x2c7   :  { %710 = vmatpush.msra.mxu3 %v567_v50  ;;  %v577_v50 = vld [vmem:[%s3100_s3 + $0x38] sm:$0xff] }
 0x2c8   :  { %v2513_v58 = vpop.f32.mrf.mxu1 }
 0x2c9   :  { %711 = vmatpush.msra.mxu3 %v564_v45  ;;  %v576_v45 = vld [vmem:[%s3100_s3 + $0x30] sm:$0xff] }
 0x2cb   :  { %712 = vmatpush.msra.mxu3 %v561_v44  ;;  %v575_v44 = vld [vmem:[%s3100_s3 + $0x28] sm:$0xff] }
 0x2cd   :  { %713 = vmatpush.msra.mxu3 %v558_v41  ;;  %v1552_v41 = vld [vmem:[%s3099_s4 + $0x180] sm:$0xff] }
 0x2ce   :  { %700 = vmatmul.f32.gmra.mxu3 %v1525_v57  ;;  %688 = vmatmul.f32.gmra.mxu2 %v1521_v21 }
 0x2cf   :  { %714 = vmatpush.msra.mxu3 %v2484_v39  ;;  %v574_v39 = vld [vmem:[%s3100_s3 + $0x20] sm:$0xff] }
 0x2d0   :  { %v2522_v60 = vpop.f32.mrf.mxu1 }
 0x2d1   :  { %715 = vmatpush.msra.mxu3 %v2481_v55 }
 0x2d3   :  { %716 = vmatpush.msra.mxu3 %v2478_v24  ;;  %v573_v24 = vld [vmem:[%s3100_s3 + $0x18] sm:$0xff] }
 0x2d5   :  { %717 = vmatpush.msra.mxu3 %v2475_v20  ;;  %v1557_v20 = vld [vmem:[%s3099_s4 + $0x1a8] sm:$0xff] }
 0x2d6   :  { %703 = vmatmul.f32.gmra.mxu3 %v1526_v12  ;;  %691 = vmatmul.f32.gmra.mxu2 %v1522_v1 }
 0x2d7   :  { %718 = vmatpush.msra.mxu3 %v2472_v23 }
 0x2d8   :  { %v2534_v28 = vpop.f32.mrf.mxu1 }
 0x2d9   :  { %719 = vmatpush.msra.mxu3 %v2469_v19  ;;  %v572_v19 = vld [vmem:[%s3100_s3 + $0x10] sm:$0xff] }
 0x2db   :  { %720 = vmatpush.msra.mxu3 %v2466_v33  ;;  %v1561_v33 = vld [vmem:[%s3099_s4 + $0x1c8] sm:$0xff] }
 0x2dd   :  { %721 = vmatpush.msra.mxu3 %v2463_v27 }
 0x2de   :  { %706 = vmatmul.f32.gmra.mxu3 %v1527_v54  ;;  %694 = vmatmul.f32.gmra.mxu2 %v1523_v47 }
 0x2df   :  { %722 = vmatpush.msra.mxu3 %v2458_v11  ;;  %v1566_v11 = vld [vmem:[%s3099_s4 + $0x1f0] sm:$0xff] }
 0x2e0   :  { %v2546_v43 = vpop.f32.mrf.mxu1 }
 0x2e1   :  { %723 = vmatpush.msra.mxu3 %v2453_v32  ;;  %v571_v32 = vld [vmem:[%s3100_s3 + $0x8] sm:$0xff] }
 0x2e3   :  { %724 = vmatpush.msra.mxu3 %v2448_v52  ;;  %v1565_v52 = vld [vmem:[%s3099_s4 + $0x1e8] sm:$0xff] }
 0x2e5   :  { %725 = vmatpush.msra.mxu3 %v2443_v7  ;;  %v1564_v7 = vld [vmem:[%s3099_s4 + $0x1e0] sm:$0xff] }
 0x2e6   :  { %726 = vmatmul.f32.vlgmr.msra.gmra.mxu3 %v570_v8 }
 0x2e7   :  { %908 = vmatpush.msrb.mxu3 %v1567_v61 }
 0x2e8   :  { %v809_v18 = vpop.f32.mrf.mxu1 }
 0x2e9   :  { %909 = vmatpush.msrb.mxu3 %v1566_v11 }
 0x2eb   :  { %910 = vmatpush.msrb.mxu3 %v1565_v52 }
 0x2ed   :  { %911 = vmatpush.msrb.mxu3 %v1564_v7 }
 0x2ee   :  { %729 = vmatmul.f32.gmra.mxu3 %v571_v32 }
 0x2ef   :  { %912 = vmatpush.msrb.mxu3 %v1563_v15 }
 0x2f0   :  { %v812_v27 = vpop.f32.mrf.mxu1 }
 0x2f1   :  { %913 = vmatpush.msrb.mxu3 %v1562_v14 }
 0x2f3   :  { %914 = vmatpush.msrb.mxu3 %v1561_v33 }
 0x2f5   :  { %915 = vmatpush.msrb.mxu3 %v1560_v17 }
 0x2f6   :  { %732 = vmatmul.f32.gmra.mxu3 %v572_v19 }
 0x2f7   :  { %916 = vmatpush.msrb.mxu3 %v1559_v4 }
 0x2f8   :  { %v815_v23 = vpop.f32.mrf.mxu1 }
 0x2f9   :  { %917 = vmatpush.msrb.mxu3 %v1558_v46 }
 0x2fb   :  { %918 = vmatpush.msrb.mxu3 %v1557_v20 }
 0x2fd   :  { %919 = vmatpush.msrb.mxu3 %v1556_v6 }
 0x2fe   :  { %735 = vmatmul.f32.gmra.mxu3 %v573_v24 }
 0x2ff   :  { %920 = vmatpush.msrb.mxu3 %v1555_v40 }
 0x300   :  { %v818_v55 = vpop.f32.mrf.mxu1 }
 0x301   :  { %921 = vmatpush.msrb.mxu3 %v1554_v36 }
 0x303   :  { %922 = vmatpush.msrb.mxu3 %v1553_v0  ;;  %v1569_v0 = vld [vmem:[%s3100_s3 + $0xc8] sm:$0xff] }
 0x305   :  { %923 = vmatpush.msrb.mxu3 %v1552_v41  ;;  %v1570_v41 = vld [vmem:[%s3100_s3 + $0xd0] sm:$0xff] }
 0x306   :  { %738 = vmatmul.f32.gmra.mxu3 %v574_v39  ;;  %v1568_v39 = vld [vmem:[%s3100_s3 + $0xc0] sm:$0xff] }
 0x308   :  { %v821_v63 = vpop.f32.mrf.mxu1 }
 0x30e   :  { %741 = vmatmul.f32.gmra.mxu3 %v575_v44  ;;  %v1078_v44 = vld [vmem:[%s3102_s7 + $0x78] sm:$0xff] }
 0x30f   :  { %1079 = vmatpush.msrb.mxu1 %v1078_v44 }
 0x310   :  { %v824_v48 = vpop.f32.mrf.mxu1 }
 0x316   :  { %744 = vmatmul.f32.gmra.mxu3 %v576_v45  ;;  %v1572_v45 = vld [vmem:[%s3100_s3 + $0xe0] sm:$0xff] }
 0x318   :  { %v827_v34 = vpop.f32.mrf.mxu1 }
 0x31e   :  { %747 = vmatmul.f32.gmra.mxu3 %v577_v50  ;;  %v1574_v50 = vld [vmem:[%s3100_s3 + $0xf0] sm:$0xff] }
 0x320   :  { %v830_v49 = vpop.f32.mrf.mxu1 }
 0x321   :  { %842 = vmatpush.msra.mxu2 %v830_v49  ;;  %v1575_v49 = vld [vmem:[%s3100_s3 + $0xf8] sm:$0xff] }
 0x323   :  { %843 = vmatpush.msra.mxu2 %v827_v34  ;;  %v1573_v34 = vld [vmem:[%s3100_s3 + $0xe8] sm:$0xff] }
 0x325   :  { %844 = vmatpush.msra.mxu2 %v824_v48  ;;  %v1077_v48 = vld [vmem:[%s3102_s7 + $0x70] sm:$0xff] }
 0x326   :  { %924 = vmatmul.f32.vlgmr.msrb.gmra.mxu3 %v2216_v30  ;;  %v1544_v30 = vld [vmem:[%s3100_s3 + $0x80] sm:$0xff]  ;;  %1080 = vmatpush.msrb.mxu1 %v1077_v48 }
 0x327   :  { %845 = vmatpush.msra.mxu2 %v821_v63  ;;  %v1571_v63 = vld [vmem:[%s3100_s3 + $0xd8] sm:$0xff] }
 0x329   :  { %846 = vmatpush.msra.mxu2 %v818_v55 }
 0x32b   :  { %847 = vmatpush.msra.mxu2 %v815_v23 }
 0x32d   :  { %848 = vmatpush.msra.mxu2 %v812_v27 }
 0x32e   :  { %927 = vmatmul.f32.gmra.mxu3 %v2228_v2  ;;  %v1545_v2 = vld [vmem:[%s3100_s3 + $0x88] sm:$0xff] }
 0x32f   :  { %849 = vmatpush.msra.mxu2 %v809_v18 }
 0x331   :  { %850 = vmatpush.msra.mxu2 %v2546_v43 }
 0x333   :  { %851 = vmatpush.msra.mxu2 %v2534_v28 }
 0x335   :  { %852 = vmatpush.msra.mxu2 %v2522_v60 }
 0x336   :  { %930 = vmatmul.f32.gmra.mxu3 %v2240_v22 }
 0x337   :  { %853 = vmatpush.msra.mxu2 %v2513_v58 }
 0x339   :  { %854 = vmatpush.msra.mxu2 %v2499_v56 }
 0x33b   :  { %855 = vmatpush.msra.mxu2 %v2495_v9 }
 0x33d   :  { %856 = vmatpush.msra.mxu2 %v2493_v53  ;;  %v1546_v53 = vld [vmem:[%s3100_s3 + $0x90] sm:$0xff] }
 0x33e   :  { %933 = vmatmul.f32.gmra.mxu3 %v2252_v59  ;;  %v1547_v59 = vld [vmem:[%s3100_s3 + $0x98] sm:$0xff] }
 0x33f   :  { %857 = vmatpush.msra.mxu2 %v2491_v25 }
 0x340   :  { %858 = vmatmul.f32.vlgmr.msra.gmra.mxu2 %v1544_v30  ;;  %v1076_v30 = vld [vmem:[%s3102_s7 + $0x68] sm:$0xff] }
 0x341   :  { %1081 = vmatpush.msrb.mxu1 %v1076_v30 }
 0x346   :  { %936 = vmatmul.f32.gmra.mxu3 %v2264_v16  ;;  %v1548_v16 = vld [vmem:[%s3100_s3 + $0xa0] sm:$0xff] }
 0x348   :  { %861 = vmatmul.f32.gmra.mxu2 %v1545_v2  ;;  %v1075_v2 = vld [vmem:[%s3102_s7 + $0x60] sm:$0xff] }
 0x349   :  { %v698_v22 = vpop.f32.mrf.mxu3  ;;  %v2680_v60 = vpop.f32.mrf.mxu2  ;;  %1082 = vmatpush.msrb.mxu1 %v1075_v2 }
 0x34e   :  { %939 = vmatmul.f32.gmra.mxu3 %v2276_v29  ;;  %v1549_v29 = vld [vmem:[%s3100_s3 + $0xa8] sm:$0xff] }
 0x350   :  { %864 = vmatmul.f32.gmra.mxu2 %v1546_v53  ;;  %v1591_v53 = vld [vmem:[%s3102_s7 + $0xf8] sm:$0xff] }
 0x351   :  { %v701_v9 = vpop.f32.mrf.mxu3  ;;  %v689_v12 = vpop.f32.mrf.mxu2 }
 0x356   :  { %942 = vmatmul.f32.gmra.mxu3 %v2288_v31 }
 0x358   :  { %867 = vmatmul.f32.gmra.mxu2 %v1547_v59  ;;  %v1589_v59 = vld [vmem:[%s3102_s7 + $0xe8] sm:$0xff] }
 0x359   :  { %v2650_v25 = vpop.f32.mrf.mxu3  ;;  %v692_v1 = vpop.f32.mrf.mxu2 }
 0x35e   :  { %945 = vmatmul.f32.gmra.mxu3 %v2300_v35 }
 0x360   :  { %870 = vmatmul.f32.gmra.mxu2 %v1548_v16  ;;  %v1074_v16 = vld [vmem:[%s3102_s7 + $0x58] sm:$0xff] }
 0x361   :  { %v2656_v56 = vpop.f32.mrf.mxu3  ;;  %1083 = vmatpush.msrb.mxu1 %v1074_v16 }
 0x366   :  { %948 = vmatmul.f32.gmra.mxu3 %v2312_v38 }
 0x368   :  { %873 = vmatmul.f32.gmra.mxu2 %v1549_v29  ;;  %v1588_v29 = vld [vmem:[%s3102_s7 + $0xe0] sm:$0xff] }
 0x369   :  { %v2662_v31 = vpop.f32.mrf.mxu3 }
 0x36e   :  { %951 = vmatmul.f32.gmra.mxu3 %v2333_v10 }
 0x370   :  { %876 = vmatmul.f32.gmra.mxu2 %v1550_v13 }
 0x371   :  { %v730_v35 = vpop.f32.mrf.mxu3 }
 0x376   :  { %954 = vmatmul.f32.gmra.mxu3 %v2360_v42 }
 0x378   :  { %879 = vmatmul.f32.gmra.mxu2 %v1551_v26  ;;  %v1586_v26 = vld [vmem:[%s3102_s7 + $0xd0] sm:$0xff] }
 0x379   :  { %v733_v58 = vpop.f32.mrf.mxu3 }
 0x37a   :  { %v734_v11 = vadd.f32 %v733_v58, %v692_v1  ;;  %v1585_v58 = vld [vmem:[%s3102_s7 + $0xc8] sm:$0xff]  ;;  %v1582_v1 = vld [vmem:[%s3102_s7 + $0xb0] sm:$0xff] }
 0x37e   :  { %957 = vmatmul.f32.gmra.mxu3 %v2384_v5 }
 0x381   :  { %v2673_v38 = vpop.f32.mrf.mxu3 }
 0x386   :  { %960 = vmatmul.f32.gmra.mxu3 %v2408_v62  ;;  %v2685_v62 = vpop.f32.mrf.mxu2 }
 0x389   :  { %v739_v57 = vpop.f32.mrf.mxu3 }
 0x38a   :  { %v740_v27 = vadd.f32 %v739_v57, %v698_v22  ;;  %v1073_v57 = vld [vmem:[%s3102_s7 + $0x50] sm:$0xff] }
 0x38b   :  { %1084 = vmatpush.msrb.mxu1 %v1073_v57  ;;  %v1601_v57 = vld [vmem:[%s3102_s7 + $0x118] sm:$0xff] }
 0x38e   :  { %963 = vmatmul.f32.gmra.mxu3 %v2427_v51 }
 0x391   :  { %v742_v10 = vpop.f32.mrf.mxu3 }
 0x392   :  { %v743_v19 = vadd.f32 %v742_v10, %v701_v9  ;;  %v1590_v9 = vld [vmem:[%s3102_s7 + $0xf0] sm:$0xff]  ;;  %v1584_v10 = vld [vmem:[%s3102_s7 + $0xc0] sm:$0xff] }
 0x396   :  { %966 = vmatmul.f32.gmra.mxu3 %v2433_v3  ;;  %v731_v3 = vadd.f32 %v730_v35, %v689_v12  ;;  %v1587_v35 = vld [vmem:[%s3102_s7 + $0xd8] sm:$0xff] }
 0x399   :  { %v2678_v21 = vpop.f32.mrf.mxu3 }
 0x39e   :  { %969 = vmatmul.f32.gmra.mxu3 %v2439_v37 }
 0x3a1   :  { %v2683_v42 = vpop.f32.mrf.mxu3 }
 0x3a9   :  { %v925_v5 = vpop.f32.mrf.mxu3 }
 0x3b1   :  { %v928_v28 = vpop.f32.mrf.mxu3 }
 0x3b9   :  { %v931_v54 = vpop.f32.mrf.mxu3 }
 0x3c1   :  { %v934_v47 = vpop.f32.mrf.mxu3 }
 0x3c3   :  { %v2687_v51 = vpop.f32.mrf.mxu2 }
 0x3c9   :  { %v937_v43 = vpop.f32.mrf.mxu3 }
 0x3cb   :  { %v862_v8 = vpop.f32.mrf.mxu2 }
 0x3cc   :  { %v2689_v61 = vadd.f32 %v862_v8, %v731_v3  ;;  %v728_v3 = vadd.f32 %v2662_v31, %v2680_v60  ;;  %v1579_v8 = vld [vmem:[%s3102_s7 + $0x98] sm:$0xff]  ;;  %v1071_v31 = vld [vmem:[%s3102_s7 + $0x40] sm:$0xff]  ;;  %v1577_v60 = vld [vmem:[%s3102_s7 + $0x88] sm:$0xff] }
 0x3d1   :  { %v940_v18 = vpop.f32.mrf.mxu3 }
 0x3d3   :  { %v865_v37 = vpop.f32.mrf.mxu2 }
 0x3d4   :  { %v2691_v52 = vadd.f32 %v865_v37, %v734_v11  ;;  %v1578_v11 = vld [vmem:[%s3102_s7 + $0x90] sm:$0xff]  ;;  %v2796_v37 = vld [vmem:[%s3101_s5] ss:$0 sm:$0xff] }
 0x3d9   :  { %v943_v7 = vpop.f32.mrf.mxu3 }
 0x3db   :  { %v2693_v32 = vpop.f32.mrf.mxu2 }
 0x3e1   :  { %v946_v15 = vpop.f32.mrf.mxu3 }
 0x3e3   :  { %v871_v14 = vpop.f32.mrf.mxu2 }
 0x3e4   :  { %v2695_v33 = vadd.f32 %v871_v14, %v740_v27  ;;  %v1070_v27 = vld [vmem:[%s3102_s7 + $0x38] sm:$0xff] }
 0x3e5   :  { %v1613_v14 = vld [vmem:[%s3102_s7 + $0x178] sm:$0xff] }
 0x3e9   :  { %v949_v17 = vpop.f32.mrf.mxu3 }
 0x3eb   :  { %v874_v4 = vpop.f32.mrf.mxu2 }
 0x3ec   :  { %v2697_v23 = vadd.f32 %v874_v4, %v743_v19  ;;  %v1069_v4 = vld [vmem:[%s3102_s7 + $0x30] sm:$0xff] }
 0x3f1   :  { %v952_v46 = vpop.f32.mrf.mxu3 }
 0x3f3   :  { %v2735_v22 = vpop.f32.mrf.mxu2 }
 0x3f9   :  { %v955_v20 = vpop.f32.mrf.mxu3 }
 0x3fb   :  { %v2752_v13 = vpop.f32.mrf.mxu2 }
 0x401   :  { %v958_v6 = vpop.f32.mrf.mxu3 }
 0x409   :  { %v961_v24 = vpop.f32.mrf.mxu3 }
 0x411   :  { %v964_v40 = vpop.f32.mrf.mxu3 }
 0x419   :  { %v967_v55 = vpop.f32.mrf.mxu3 }
 0x421   :  { %v970_v36 = vpop.f32.mrf.mxu3 }
 0x422   :  { %982 = vmatpush.msrb.mxu2 %v970_v36 }
 0x424   :  { %983 = vmatpush.msrb.mxu2 %v967_v55 }
 0x426   :  { %984 = vmatpush.msrb.mxu2 %v964_v40 }
 0x428   :  { %985 = vmatpush.msrb.mxu2 %v961_v24  ;;  %v737_v24 = vadd.f32 %v2673_v38, %v2685_v62  ;;  %v1066_v62 = vld [vmem:[%s3102_s7 + $0x18] sm:$0xff] }
 0x42a   :  { %986 = vmatpush.msrb.mxu2 %v958_v6  ;;  %v1068_v6 = vld [vmem:[%s3102_s7 + $0x28] sm:$0xff] }
 0x42c   :  { %987 = vmatpush.msrb.mxu2 %v955_v20 }
 0x42e   :  { %988 = vmatpush.msrb.mxu2 %v952_v46  ;;  %v1612_v46 = vld [vmem:[%s3102_s7 + $0x170] sm:$0xff] }
 0x430   :  { %989 = vmatpush.msrb.mxu2 %v949_v17 }
 0x432   :  { %990 = vmatpush.msrb.mxu2 %v946_v15 }
 0x434   :  { %991 = vmatpush.msrb.mxu2 %v943_v7 }
 0x436   :  { %992 = vmatpush.msrb.mxu2 %v940_v18  ;;  %v883_v18 = vadd.f32 %v2687_v51, %v728_v3  ;;  %v1576_v51 = vld [vmem:[%s3102_s7 + $0x80] sm:$0xff] }
 0x438   :  { %993 = vmatpush.msrb.mxu2 %v937_v43 }
 0x43a   :  { %994 = vmatpush.msrb.mxu2 %v934_v47  ;;  %v1580_v47 = vld [vmem:[%s3102_s7 + $0xa0] sm:$0xff] }
 0x43c   :  { %995 = vmatpush.msrb.mxu2 %v931_v54  ;;  %v1581_v54 = vld [vmem:[%s3102_s7 + $0xa8] sm:$0xff] }
 0x43e   :  { %996 = vmatpush.msrb.mxu2 %v928_v28  ;;  %v1072_v28 = vld [vmem:[%s3102_s7 + $0x48] sm:$0xff] }
 0x43f   :  { %1085 = vmatpush.msrb.mxu1 %v1072_v28  ;;  %v746_v28 = vadd.f32 %v2678_v21, %v2650_v25 }
 0x440   :  { %997 = vmatpush.msrb.mxu2 %v925_v5  ;;  %v1583_v5 = vld [vmem:[%s3102_s7 + $0xb8] sm:$0xff] }
 0x441   :  { %998 = vmatmul.f32.vlgmr.msrb.gmra.mxu2 %v1568_v39  ;;  %1086 = vmatpush.msrb.mxu1 %v1071_v31  ;;  %v1067_v39 = vld [vmem:[%s3102_s7 + $0x20] sm:$0xff] }
 0x442   :  { %1121 = vmatpush.msra.mxu2 %v1591_v53  ;;  %v1063_v53 = vld [vmem:[%s3102_s7] sm:$0xff] }
 0x443   :  { %1087 = vmatpush.msrb.mxu1 %v1070_v27 }
 0x444   :  { %1122 = vmatpush.msra.mxu2 %v1590_v9  ;;  %v1606_v9 = vld [vmem:[%s3102_s7 + $0x140] sm:$0xff] }
 0x445   :  { %1088 = vmatpush.msrb.mxu1 %v1069_v4 }
 0x446   :  { %1123 = vmatpush.msra.mxu2 %v1589_v59 }
 0x447   :  { %1089 = vmatpush.msrb.mxu1 %v1068_v6 }
 0x448   :  { %1124 = vmatpush.msra.mxu2 %v1588_v29  ;;  %v1605_v29 = vld [vmem:[%s3102_s7 + $0x138] sm:$0xff] }
 0x449   :  { %1001 = vmatmul.f32.gmra.mxu2 %v1569_v0  ;;  %v1610_v0 = vld [vmem:[%s3102_s7 + $0x160] sm:$0xff]  ;;  %1090 = vmatpush.msrb.mxu1 %v1067_v39 }
 0x44a   :  { %1125 = vmatpush.msra.mxu2 %v1587_v35  ;;  %v1604_v35 = vld [vmem:[%s3102_s7 + $0x130] sm:$0xff] }
 0x44b   :  { %1091 = vmatpush.msrb.mxu1 %v1066_v62  ;;  %v1628_v62 = vld [vmem:[%s3102_s7 + $0x1d0] sm:$0xff] }
 0x44c   :  { %1126 = vmatpush.msra.mxu2 %v1586_v26  ;;  %v1603_v26 = vld [vmem:[%s3102_s7 + $0x128] sm:$0xff] }
 0x44e   :  { %1127 = vmatpush.msra.mxu2 %v1585_v58  ;;  %v1602_v58 = vld [vmem:[%s3102_s7 + $0x120] sm:$0xff] }
 0x450   :  { %1128 = vmatpush.msra.mxu2 %v1584_v10 }
 0x451   :  { %1004 = vmatmul.f32.gmra.mxu2 %v1570_v41  ;;  %v886_v41 = vadd.f32 %v2693_v32, %v737_v24  ;;  %v1065_v32 = vld [vmem:[%s3102_s7 + $0x10] sm:$0xff]  ;;  %v1633_v24 = vld [vmem:[%s3102_s7 + $0x1f8] sm:$0xff] }
 0x452   :  { %1129 = vmatpush.msra.mxu2 %v1583_v5  ;;  %1092 = vmatpush.msrb.mxu1 %v1065_v32  ;;  %v1599_v5 = vld [vmem:[%s3102_s7 + $0x108] sm:$0xff]  ;;  %v1593_v32 = vld [vmem:[%s3103_s6 + $0x18] sm:$0xff] }
 0x454   :  { %1130 = vmatpush.msra.mxu2 %v1582_v1  ;;  %v1598_v1 = vld [vmem:[%s3102_s7 + $0x100] sm:$0xff] }
 0x456   :  { %1131 = vmatpush.msra.mxu2 %v1581_v54 }
 0x458   :  { %1132 = vmatpush.msra.mxu2 %v1580_v47  ;;  %v889_v47 = vadd.f32 %v2735_v22, %v746_v28  ;;  %v1635_v28 = vld [vmem:[%s3103_s6 + $0x38] sm:$0xff] }
 0x459   :  { %1007 = vmatmul.f32.gmra.mxu2 %v1571_v63 }
 0x45a   :  { %1133 = vmatpush.msra.mxu2 %v1579_v8 }
 0x45c   :  { %1134 = vmatpush.msra.mxu2 %v1578_v11  ;;  %v749_v11 = vadd.f32 %v2683_v42, %v2656_v56  ;;  %v1694_v56 = vld [vmem:[%s3101_s5 + $0x2] ss:$0 sm:$0xff] }
 0x45e   :  { %1135 = vmatpush.msra.mxu2 %v1577_v60  ;;  %v890_v25 = vadd.f32 %v2752_v13, %v749_v11  ;;  %v1383_v11 = vld [vmem:[%s3105_s9 + $0x40] sm:$0xff] }
 0x460   :  { %1136 = vmatpush.msra.mxu2 %v1576_v51 }
 0x461   :  { %1010 = vmatmul.f32.gmra.mxu2 %v1572_v45  ;;  %v1608_v45 = vld [vmem:[%s3102_s7 + $0x150] sm:$0xff] }
 0x462   :  { %1223 = vmatpush.msrb.mxu2 %v1613_v14 }
 0x464   :  { %1224 = vmatpush.msrb.mxu2 %v1612_v46 }
 0x469   :  { %1013 = vmatmul.f32.gmra.mxu2 %v1573_v34 }
 0x471   :  { %1016 = vmatmul.f32.gmra.mxu2 %v1574_v50  ;;  %v1064_v50 = vld [vmem:[%s3102_s7 + $0x8] sm:$0xff] }
 0x472   :  { %1093 = vmatpush.msrb.mxu1 %v1064_v50  ;;  %v1623_v50 = vld [vmem:[%s3102_s7 + $0x1a8] sm:$0xff] }
 0x474   :  { %1094 = vmatpush.msrb.mxu1 %v1063_v53  ;;  %v1621_v53 = vld [vmem:[%s3102_s7 + $0x198] sm:$0xff] }
 0x479   :  { %1019 = vmatmul.f32.gmra.mxu2 %v1575_v49  ;;  %v1607_v49 = vld [vmem:[%s3102_s7 + $0x148] sm:$0xff] }
 0x4c4   :  { %v999_v12 = vpop.f32.mrf.mxu2 }
 0x4c5   :  { %v1023_v7 = vadd.f32 %v999_v12, %v883_v18  ;;  %v1600_v12 = vld [vmem:[%s3102_s7 + $0x110] sm:$0xff] }
 0x4c7   :  { %v1033_v17 = vadd.f32 %v2796_v37, %v1023_v7 }
 0x4c9   :  { %v1041_v40 = vmax.f32 %v1033_v17, 0.0 }
 0x4cc   :  { %v1002_v43 = vpop.f32.mrf.mxu2 }
 0x4cd   :  { %v1024_v55 = vadd.f32 %v1002_v43, %v2689_v61  ;;  %v1609_v61 = vld [vmem:[%s3102_s7 + $0x158] sm:$0xff] }
 0x4cf   :  { %v1034_v44 = vadd.f32 %v2796_v37, %v1024_v55  ;;  %v1632_v55 = vld [vmem:[%s3102_s7 + $0x1f0] sm:$0xff] }
 0x4d1   :  { %v1042_v30 = vmax.f32 %v1034_v44, 0.0 }
 0x4d4   :  { %v1005_v15 = vpop.f32.mrf.mxu2 }
 0x4d5   :  { %v1025_v19 = vadd.f32 %v1005_v15, %v2691_v52  ;;  %v1611_v52 = vld [vmem:[%s3102_s7 + $0x168] sm:$0xff] }
 0x4d6   :  { %1225 = vmatpush.msrb.mxu2 %v1611_v52 }
 0x4d7   :  { %v1035_v20 = vadd.f32 %v2796_v37, %v1025_v19 }
 0x4d8   :  { %1226 = vmatpush.msrb.mxu2 %v1610_v0  ;;  %v1630_v0 = vld [vmem:[%s3102_s7 + $0x1e0] sm:$0xff] }
 0x4d9   :  { %v1043_v36 = vmax.f32 %v1035_v20, 0.0 }
 0x4da   :  { %1227 = vmatpush.msrb.mxu2 %v1609_v61  ;;  %v1627_v61 = vld [vmem:[%s3102_s7 + $0x1c8] sm:$0xff] }
 0x4db   :  { %v2838_v63 = vmax.f32 %v1041_v40, %v1043_v36  ;;  %v1102_v40 = vld [vmem:[%s3103_s6] sm:$0xff]  ;;  %v1631_v36 = vld [vmem:[%s3102_s7 + $0x1e8] sm:$0xff] }
 0x4dc   :  { %v1008_v38 = vpop.f32.mrf.mxu2  ;;  %1228 = vmatpush.msrb.mxu2 %v1608_v45  ;;  %v1625_v45 = vld [vmem:[%s3102_s7 + $0x1b8] sm:$0xff] }
 0x4dd   :  { %v1026_v48 = vadd.f32 %v1008_v38, %v886_v41  ;;  %v1592_v41 = vld [vmem:[%s3103_s6 + $0x10] sm:$0xff]  ;;  %v1103_v38 = vld [vmem:[%s3103_s6 + $0x8] sm:$0xff] }
 0x4de   :  { %1229 = vmatpush.msrb.mxu2 %v1607_v49 }
 0x4df   :  { %v1036_v34 = vadd.f32 %v2796_v37, %v1026_v48  ;;  %v1626_v48 = vld [vmem:[%s3102_s7 + $0x1c0] sm:$0xff] }
 0x4e0   :  { %1230 = vmatpush.msrb.mxu2 %v1606_v9  ;;  %v1620_v9 = vld [vmem:[%s3102_s7 + $0x190] sm:$0xff] }
 0x4e1   :  { %v1044_v2 = vmax.f32 %v1036_v34, 0.0  ;;  %v1624_v34 = vld [vmem:[%s3102_s7 + $0x1b0] sm:$0xff] }
 0x4e2   :  { %1231 = vmatpush.msrb.mxu2 %v1605_v29  ;;  %v1615_v29 = vld [vmem:[%s3103_s6 + $0x28] sm:$0xff] }
 0x4e3   :  { %v1050_v59 = vmax.f32 %v1042_v30, %v1044_v2  ;;  %v1622_v30 = vld [vmem:[%s3102_s7 + $0x1a0] sm:$0xff] }
 0x4e4   :  { %v1011_v16 = vpop.f32.mrf.mxu2  ;;  %1232 = vmatpush.msrb.mxu2 %v1604_v35  ;;  %v1614_v2 = vld [vmem:[%s3103_s6 + $0x20] sm:$0xff] }
 0x4e5   :  { %v1027_v54 = vadd.f32 %v1011_v16, %v2695_v33  ;;  %v1693_v33 = vld [vmem:[%s3101_s5 + $0x1] ss:$0 sm:$0xff] }
 0x4e6   :  { %1233 = vmatpush.msrb.mxu2 %v1603_v26  ;;  %v1618_v16 = vld [vmem:[%s3102_s7 + $0x180] sm:$0xff]  ;;  %v1390_v26 = vld [vmem:[%s3105_s9 + $0x78] sm:$0xff] }
 0x4e7   :  { %v1037_v3 = vadd.f32 %v2796_v37, %v1027_v54 }
 0x4e8   :  { %1234 = vmatpush.msrb.mxu2 %v1602_v58  ;;  %v1389_v58 = vld [vmem:[%s3105_s9 + $0x70] sm:$0xff] }
 0x4e9   :  { %v1045_v7 = vmax.f32 %v1037_v3, 0.0 }
 0x4ea   :  { %1235 = vmatpush.msrb.mxu2 %v1601_v57 }
 0x4ec   :  { %v1014_v10 = vpop.f32.mrf.mxu2  ;;  %1236 = vmatpush.msrb.mxu2 %v1600_v12 }
 0x4ed   :  { %v1028_v31 = vadd.f32 %v1014_v10, %v2697_v23  ;;  %v1388_v10 = vld [vmem:[%s3105_s9 + $0x68] sm:$0xff] }
 0x4ee   :  { %1237 = vmatpush.msrb.mxu2 %v1599_v5 }
 0x4ef   :  { %v1038_v51 = vadd.f32 %v2796_v37, %v1028_v31  ;;  %v1381_v31 = vld [vmem:[%s3105_s9 + $0x30] sm:$0xff] }
 0x4f0   :  { %1238 = vmatpush.msrb.mxu2 %v1598_v1  ;;  %v1634_v1 = vld [vmem:[%s3103_s6 + $0x30] sm:$0xff] }
 0x4f1   :  { %v1046_v14 = vmax.f32 %v1038_v51, 0.0  ;;  %v1376_v51 = vld [vmem:[%s3105_s9 + $0x8] sm:$0xff] }
 0x4f4   :  { %v1017_v43 = vpop.f32.mrf.mxu2 }
 0x4f5   :  { %v1029_v8 = vadd.f32 %v1017_v43, %v889_v47  ;;  %v1387_v47 = vld [vmem:[%s3105_s9 + $0x60] sm:$0xff]  ;;  %v1386_v43 = vld [vmem:[%s3105_s9 + $0x58] sm:$0xff] }
 0x4f7   :  { %v1039_v18 = vadd.f32 %v2796_v37, %v1029_v8  ;;  %v1385_v8 = vld [vmem:[%s3105_s9 + $0x50] sm:$0xff] }
 0x4f9   :  { %v1047_v60 = vmax.f32 %v1039_v18, 0.0  ;;  %v1384_v18 = vld [vmem:[%s3105_s9 + $0x48] sm:$0xff] }
 0x4fb   :  { %v1051_v21 = vmax.f32 %v1045_v7, %v1047_v60  ;;  %v1382_v7 = vld [vmem:[%s3105_s9 + $0x38] sm:$0xff] }
 0x4fc   :  { %v1020_v22 = vpop.f32.mrf.mxu2 }
 0x4fd   :  { %v1053_v15 = vmax.f32 %v2838_v63, %v1051_v21  ;;  %v1030_v42 = vadd.f32 %v1020_v22, %v890_v25  ;;  %v1629_v63 = vld [vmem:[%s3102_s7 + $0x1d8] sm:$0xff]  ;;  %v1380_v25 = vld [vmem:[%s3105_s9 + $0x28] sm:$0xff]  ;;  %v1379_v21 = vld [vmem:[%s3105_s9 + $0x20] sm:$0xff] }
 0x4fe   :  { %v1377_v22 = vld [vmem:[%s3105_s9 + $0x10] sm:$0xff] }
 0x4ff   :  { %v1057_v27 = vmul.f32 %v1693_v33, %v1053_v15  ;;  %v1040_v23 = vadd.f32 %v2796_v37, %v1030_v42  ;;  %v1375_v15 = vld [vmem:[%s3105_s9] sm:$0xff]  ;;  %v1419_v42 = vld [vmem:[%s3107_s11 + $0x18] sm:$0xff] }
 0x501   :  { %v2909_v13 = vadd.f32 %v1694_v56, %v1057_v27  ;;  %v1048_v17 = vmax.f32 %v1040_v23, 0.0 }
 0x503   :  { %v1052_v19 = vmax.f32 %v1046_v14, %v1048_v17  ;;  %1095 = vmatmul.f32.vlgmr.msrb.gmra.mxu1 %v2909_v13  ;;  %1137 = vmatmul.f32.vlgmr.msra.gmra.mxu2 %v2909_v13  ;;  %v1695_v17 = vld [vmem:[%s3104_s8] ss:$0 sm:$0xff] }
 0x504   :  { %1395 = vmatpush.msra.mxu2 %v1390_v26 }
 0x505   :  { %v1054_v4 = vmax.f32 %v1050_v59, %v1052_v19  ;;  %v1619_v59 = vld [vmem:[%s3102_s7 + $0x188] sm:$0xff] }
 0x506   :  { %1396 = vmatpush.msra.mxu2 %v1389_v58 }
 0x507   :  { %v1058_v46 = vmul.f32 %v1693_v33, %v1054_v4  ;;  %v1378_v33 = vld [vmem:[%s3105_s9 + $0x18] sm:$0xff] }
 0x508   :  { %1397 = vmatpush.msra.mxu2 %v1388_v10 }
 0x509   :  { %v2913_v20 = vadd.f32 %v1694_v56, %v1058_v46 }
 0x50a   :  { %1398 = vmatpush.msra.mxu2 %v1387_v47 }
 0x50b   :  { %1098 = vmatmul.f32.gmra.mxu1 %v2913_v20  ;;  %1140 = vmatmul.f32.gmra.mxu2 %v2913_v20 }
 0x50c   :  { %1399 = vmatpush.msra.mxu2 %v1386_v43 }
 0x50e   :  { %1400 = vmatpush.msra.mxu2 %v1385_v8 }
 0x510   :  { %1401 = vmatpush.msra.mxu2 %v1384_v18 }
 0x512   :  { %1402 = vmatpush.msra.mxu2 %v1383_v11 }
 0x513   :  { %1239 = vmatmul.f32.vlgmr.msrb.gmra.mxu2 %v2909_v13 }
 0x514   :  { %1403 = vmatpush.msra.mxu2 %v1382_v7 }
 0x516   :  { %1404 = vmatpush.msra.mxu2 %v1381_v31 }
 0x518   :  { %1405 = vmatpush.msra.mxu2 %v1380_v25 }
 0x51a   :  { %1406 = vmatpush.msra.mxu2 %v1379_v21 }
 0x51b   :  { %1242 = vmatmul.f32.gmra.mxu2 %v2913_v20 }
 0x51c   :  { %1407 = vmatpush.msra.mxu2 %v1378_v33 }
 0x51e   :  { %1408 = vmatpush.msra.mxu2 %v1377_v22 }
 0x520   :  { %1409 = vmatpush.msra.mxu2 %v1376_v51 }
 0x522   :  { %1410 = vmatpush.msra.mxu2 %v1375_v15 }
 0x580   :  { %v1096_v37 = vpop.f32.mrf.mxu1 }
 0x586   :  { %v1138_v6 = vpop.f32.mrf.mxu2 }
 0x588   :  { %v1099_v52 = vpop.f32.mrf.mxu1 }
 0x589   :  { %1197 = vmatpush.msra.mxu1 %v1099_v52 }
 0x58b   :  { %1198 = vmatpush.msra.mxu1 %v1096_v37 }
 0x58c   :  { %1596 = vmatmul.msk.f32.vlgmr.msra.gmra.mxu1 %vm1147_vm0, %v1102_v40 }
 0x58d   :  { %1297 = vmatpush.msrb.mxu1 %v1633_v24 }
 0x58e   :  { %v1141_v39 = vpop.f32.mrf.mxu2 }
 0x58f   :  { %1298 = vmatpush.msrb.mxu1 %v1632_v55  ;;  %1168 = vmatpush.msra.mxu3 %v1141_v39  ;;  %v1696_v39 = vld [vmem:[%s3104_s8 + $0x1] ss:$0 sm:$0xff] }
 0x591   :  { %1299 = vmatpush.msrb.mxu1 %v1631_v36  ;;  %1169 = vmatpush.msra.mxu3 %v1138_v6 }
 0x592   :  { %1594 = vmatmul.msk.f32.vlgmr.msra.gmra.mxu3 %vm1147_vm0, %v1592_v41  ;;  %v1697_v41 = vld [vmem:[%s3104_s8 + $0x2] ss:$0 sm:$0xff] }
 0x593   :  { %1300 = vmatpush.msrb.mxu1 %v1630_v0 }
 0x594   :  { %1597 = vmatmul.msk.f32.gmra.mxu1 %vm1147_vm0, %v1103_v38 }
 0x595   :  { %1301 = vmatpush.msrb.mxu1 %v1629_v63 }
 0x596   :  { %v1240_v44 = vpop.f32.mrf.mxu2 }
 0x597   :  { %1302 = vmatpush.msrb.mxu1 %v1628_v62 }
 0x599   :  { %1303 = vmatpush.msrb.mxu1 %v1627_v61  ;;  %v1418_v61 = vld [vmem:[%s3107_s11 + $0x10] sm:$0xff] }
 0x59a   :  { %1595 = vmatmul.msk.f32.gmra.mxu3 %vm1147_vm0, %v1593_v32  ;;  %v1698_v32 = vld [vmem:[%s3106_s10] ss:$0 sm:$0xff] }
 0x59b   :  { %1304 = vmatpush.msrb.mxu1 %v1626_v48  ;;  %v1416_v48 = vld [vmem:[%s3107_s11] sm:$0xff] }
 0x59d   :  { %1305 = vmatpush.msrb.mxu1 %v1625_v45 }
 0x59e   :  { %v1243_v49 = vpop.f32.mrf.mxu2 }
 0x59f   :  { %1306 = vmatpush.msrb.mxu1 %v1624_v34  ;;  %1269 = vmatpush.msrb.mxu3 %v1243_v49  ;;  %v1470_v49 = vld [vmem:[%s3110_s13 + $0x18] sm:$0xff] }
 0x5a1   :  { %1307 = vmatpush.msrb.mxu1 %v1623_v50  ;;  %1270 = vmatpush.msrb.mxu3 %v1240_v44  ;;  %v1417_v44 = vld [vmem:[%s3107_s11 + $0x8] sm:$0xff] }
 0x5a2   :  { %1616 = vmatmul.msk.f32.vlgmr.msrb.gmra.mxu3 %vm1147_vm0, %v1614_v2  ;;  %v1468_v2 = vld [vmem:[%s3110_s13 + $0x8] sm:$0xff] }
 0x5a3   :  { %1308 = vmatpush.msrb.mxu1 %v1622_v30  ;;  %v1469_v30 = vld [vmem:[%s3110_s13 + $0x10] sm:$0xff] }
 0x5a5   :  { %1309 = vmatpush.msrb.mxu1 %v1621_v53  ;;  %v1467_v53 = vld [vmem:[%s3110_s13] sm:$0xff] }
 0x5a7   :  { %1310 = vmatpush.msrb.mxu1 %v1620_v9  ;;  %v1699_v9 = vld [vmem:[%s3108_s12] ss:$0 sm:$0xff] }
 0x5a9   :  { %1311 = vmatpush.msrb.mxu1 %v1619_v59 }
 0x5aa   :  { %1617 = vmatmul.msk.f32.gmra.mxu3 %vm1147_vm0, %v1615_v29 }
 0x5ab   :  { %1312 = vmatpush.msrb.mxu1 %v1618_v16 }
 0x5ac   :  { %1313 = vmatmul.f32.vlgmr.msrb.gmra.mxu1 %v2909_v13 }
 0x5b4   :  { %1316 = vmatmul.f32.gmra.mxu1 %v2913_v20 }
 0x609   :  { %v1200_v35 = vpop.f32.mrf.mxu1 }
 0x611   :  { %v1203_v57 = vpop.f32.mrf.mxu1 }
 0x615   :  { %v1171_v54 = vpop.f32.mrf.mxu3 }
 0x616   :  { %v1201_v27 = vadd.f32 %v1200_v35, %v1171_v54 }
 0x61d   :  { %v1174_v3 = vpop.f32.mrf.mxu3 }
 0x61e   :  { %v1204_v19 = vadd.f32 %v1203_v57, %v1174_v3  ;;  %v1700_v3 = vld [vmem:[%s3109_s14] ss:$0 sm:$0xff] }
 0x625   :  { %v1272_v60 = vpop.f32.mrf.mxu3 }
 0x626   :  { %v1278_v23 = vadd.f32 %v1272_v60, %v1201_v27 }
 0x629   :  { %v1314_v12 = vpop.f32.mrf.mxu1 }
 0x62d   :  { %v1275_v56 = vpop.f32.mrf.mxu3 }
 0x62e   :  { %v1279_v46 = vadd.f32 %v1275_v56, %v1204_v19 }
 0x631   :  { %v1317_v5 = vpop.f32.mrf.mxu1 }
 0x632   :  { %1343 = vmatpush.msra.mxu3 %v1317_v5 }
 0x634   :  { %1344 = vmatpush.msra.mxu3 %v1314_v12 }
 0x635   :  { %1636 = vmatmul.msk.f32.vlgmr.msra.gmra.mxu3 %vm1147_vm0, %v1634_v1 }
 0x636   :  { %1440 = vmatpush.msrb.mxu3 %v1419_v42 }
 0x638   :  { %1441 = vmatpush.msrb.mxu3 %v1418_v61 }
 0x63a   :  { %1442 = vmatpush.msrb.mxu3 %v1417_v44 }
 0x63c   :  { %1443 = vmatpush.msrb.mxu3 %v1416_v48 }
 0x63d   :  { %1637 = vmatmul.msk.f32.gmra.mxu3 %vm1147_vm0, %v1635_v28 }
 0x63e   :  { %1490 = vmatpush.msra.mxu3 %v1470_v49 }
 0x640   :  { %1491 = vmatpush.msra.mxu3 %v1469_v30 }
 0x642   :  { %1492 = vmatpush.msra.mxu3 %v1468_v2 }
 0x644   :  { %1493 = vmatpush.msra.mxu3 %v1467_v53 }
 0x6b8   :  { %v1346_v14 = vpop.f32.mrf.mxu3 }
 0x6b9   :  { %v1352_v13 = vadd.f32 %v1346_v14, %v1278_v23 }
 0x6bb   :  { %v1356_v4 = vadd.f32 %v1695_v17, %v1352_v13 }
 0x6bd   :  { %v1358_v37 = vmax.f32 %v1356_v4, 0.0 }
 0x6bf   :  { %v1361_v24 = vrot.slane %v1358_v37, 4 }
 0x6c0   :  { %v1349_v20 = vpop.f32.mrf.mxu3 }
 0x6c1   :  { %v1353_v6 = vadd.f32 %v1349_v20, %v1279_v46  ;;  %v1363_v36 = vmax.f32 %v1358_v37, %v1361_v24 }
 0x6c3   :  { %v1357_v52 = vadd.f32 %v1695_v17, %v1353_v6 }
 0x6c5   :  { %v1359_v40 = vmax.f32 %v1357_v52, 0.0 }
 0x6c7   :  { %v1365_v55 = vrot.slane %v1359_v40, 4 }
 0x6c9   :  { %v1367_v0 = vmax.f32 %v1359_v40, %v1365_v55 }
 0x6cb   :  { %v1368_v63 = vmax.f32 %v1363_v36, %v1367_v0 }
 0x6cd   :  { %v1371_v38 = vmul.f32 %v1696_v39, %v1368_v63 }
 0x6cf   :  { %v1374_v62 = vadd.f32 %v1697_v41, %v1371_v38 }
 0x6d1   :  { %1411 = vmatmul.f32.vlgmr.msra.gmra.mxu2 %v1374_v62 }
 0x754   :  { %v1412_v45 = vpop.f32.mrf.mxu2 }
 0x755   :  { %v1413_v34 = vadd.f32 %v1698_v32, %v1412_v45 }
 0x757   :  { %v1415_v50 = vmax.f32 %v1413_v34, 0.0 }
 0x759   :  { %1638 = vmatmul.msk.f32.vlgmr.msrb.gmra.mxu3 %vm1424_vm1, %v1415_v50 }
 0x7dc   :  { %v1445_v59 = vpop.f32.mrf.mxu3 }
 0x7dd   :  { %v1446_v16 = vadd.f32 %v1699_v9, %v1445_v59 }
 0x7df   :  { %v1639_v29 = vmul.f32 -1.442695, %v1446_v16 }
 0x7e1   :  { %1701 = vpow2.f32 %v1639_v29 }
 0x7e7   :  { %v1702_v35 = vpop.eup %1701 }
 0x7e8   :  { %v1451_v26 = vadd.f32 1.0, %v1702_v35 }
 0x7ea   :  { %1703 = vrcp.f32 %v1451_v26  ;;  %v1463_v12 = vand.u32 2147483648, %v1451_v26  ;;  %v1461_v1 = vand.u32 2147483647, %v1451_v26  ;;  %vm1457_vm3 = vweird.f32 %v1451_v26 }
 0x7ec   :  { %v1464_v54 = vor.u32 1.1754944e-38, %v1463_v12  ;;  %vm1462_vm5 = vcmp.eq.f32.partialorder %v1461_v1, 8.507059e+37 }
 0x7f0   :  { %v1704_v58 = vpop.eup %1703 }
 0x7f1   :  { %v1453_v57 = vmul.f32 %v1704_v58, %v1451_v26  ;;  %vm1458_vm2 = vweird.f32 %v1704_v58 }
 0x7f2   :  { %vm1459_vm4 = vmor %vm1457_vm3, %vm1458_vm2 }
 0x7f3   :  { %v1454_v10 = vsub.f32 1.0, %v1453_v57 }
 0x7f5   :  { %v1455_v5 = vmul.f32 %v1704_v58, %v1454_v10 }
 0x7f7   :  { %v1456_v28 = vadd.f32 %v1704_v58, %v1455_v5 }
 0x7f9   :  { %v1460_v47 = vsel %vm1459_vm4, %v1704_v58, %v1456_v28 }
 0x7fa   :  { %v1465_v43 = vsel %vm1462_vm5, %v1464_v54, %v1460_v47 }
 0x7fb   :  { %1640 = vmatmul.msk.f32.vlgmr.msra.gmra.mxu3 %vm1424_vm1, %v1465_v43 }
 0x87e   :  { %v1495_v8 = vpop.f32.mrf.mxu3 }
 0x87f   :  { %v1496_v18 = vadd.f32 %v1700_v3, %v1495_v8 }
 0x881   :  { %1499 = vst.msk [vmem:[%s3111_s15] sm:$0xf] %vm1498_vm6, %v1496_v18 }

</bundles_post_ra>
